<compile_context>
chip_gen: v6e
topology: v6e:2x2x1
jax: 0.10.0
libtpu: 0.0.40
codegen_flags: <defaults>
</compile_context>

<pallas_src>
import jax
import jax.numpy as jnp
from jax.experimental import pallas as pl
from jax.experimental.pallas import tpu as pltpu

EPS = 1e-5  # PyTorch BatchNorm2d default eps


# ---------------------------- Pallas kernel ---------------------------------

def _conv_block_kernel(xp_ref, w1_ref, g1_ref, be1_ref, w2_ref, g2_ref, be2_ref,
                       o_ref, hpad_ref):
    # Lane-folded layout (channels packed into the lane axis):
    #   xp_ref   : (N, H+2, (W+2)*Cin)   f32   zero-padded input
    #   w1_ref   : (3, (W+2)*Cin,  W*Cout) bf16  banded per-row conv weights
    #   w2_ref   : (3, (W+2)*Cout, W*Cout) bf16
    #   g*/be*   : (1, Cout) f32              BatchNorm gamma / beta
    #   o_ref    : (N*H, W*Cout) f32          lane-dense output
    #   hpad_ref : (N, H+2, (W+2)*Cout) bf16  padded conv1 activation scratch
    N, Hp2, _ = xp_ref.shape
    H = Hp2 - 2
    Cout = g1_ref.shape[1]
    WpCout = hpad_ref.shape[2]
    W = WpCout // Cout - 2
    NH = N * H
    inv_r = 1.0 / (NH * W)

    def conv3x3(src_ref, w_ref):
        # 3 lane-dense MXU matmuls (one per kernel row), K = (W+2)*C.
        kdim = src_ref.shape[2]
        acc = jnp.zeros((NH, W * Cout), jnp.float32)
        for ky in range(3):
            tap = src_ref[:, ky:ky + H, :].reshape(NH, kdim)
            acc = acc + jnp.dot(tap.astype(jnp.bfloat16), w_ref[ky],
                                preferred_element_type=jnp.float32)
        return acc

    def fold_lanes(v):
        # (1, W*Cout) -> (1, Cout): sum the W per-column groups of the lane axis.
        r = v[:, 0:Cout]
        for w in range(1, W):
            r = r + v[:, w * Cout:(w + 1) * Cout]
        return r

    def tile_lanes(v):
        # (1, Cout) -> (1, W*Cout): repeat the per-channel vector across W groups.
        return jnp.concatenate([v] * W, axis=-1)

    def bn_relu(y, gamma, beta):
        # Training-mode BatchNorm2d (two-pass biased batch variance) + ReLU, f32.
        mean_c = fold_lanes(jnp.sum(y, axis=0, keepdims=True)) * inv_r     # (1, Cout)
        d = y - tile_lanes(mean_c)
        var_c = fold_lanes(jnp.sum(d * d, axis=0, keepdims=True)) * inv_r  # (1, Cout)
        scale_c = gamma * jax.lax.rsqrt(var_c + EPS)
        return jnp.maximum(d * tile_lanes(scale_c) + tile_lanes(beta), 0.0)

    # ---- conv1 (3x3, pad=1) -> BN -> ReLU -----------------------------------
    # Conv bias omitted: exactly canceled by the BN mean subtraction.
    h = bn_relu(conv3x3(xp_ref, w1_ref), g1_ref[...], be1_ref[...])       # (NH, W*Cout) f32

    # ---- padded bf16 scratch: zero halo only, write interior once -----------
    zrow = jnp.zeros((N, 1, WpCout), jnp.bfloat16)
    zcol = jnp.zeros((N, H, Cout), jnp.bfloat16)
    hpad_ref[:, 0:1, :] = zrow
    hpad_ref[:, H + 1:H + 2, :] = zrow
    hpad_ref[:, 1:H + 1, 0:Cout] = zcol
    hpad_ref[:, 1:H + 1, (W + 1) * Cout:(W + 2) * Cout] = zcol
    hpad_ref[:, 1:H + 1, Cout:(W + 1) * Cout] = (
        h.astype(jnp.bfloat16).reshape(N, H, W * Cout))

    # ---- conv2 (3x3, pad=1) -> BN -> ReLU -----------------------------------
    out = bn_relu(conv3x3(hpad_ref, w2_ref), g2_ref[...], be2_ref[...])   # (NH, W*Cout) f32
    o_ref[...] = out.astype(o_ref.dtype)                                  # lane-dense store


# ---------------------------- wrapper ----------------------------------------

def _banded_weights(w_oihw, width):
    """OIHW 3x3 conv weight -> banded, lane-folded matmul operands.

    Returns (3, (width+2)*Cin, width*Cout) bf16 where, for kernel row ky,
      M[ky, (q+kx)*Cin + c, q*Cout + o] = w[o, c, ky, kx]
    so that  y_row = sum_ky  x_padded_row_ky @ M[ky]  computes the 3x3 conv for
    one output row with channels folded into the lane axis.
    """
    Cout, Cin, KH, KW = w_oihw.shape
    wk = jnp.transpose(w_oihw, (2, 3, 1, 0)).astype(jnp.float32)      # (ky, kx, Cin, Cout)
    shifts = jnp.stack([jnp.eye(width + 2, width, k=-kx, dtype=jnp.float32)
                        for kx in range(KW)])                          # (kx, W+2, W)
    mats = jnp.einsum('xpq,yxco->ypcqo', shifts, wk)                   # (ky, W+2, Cin, W, Cout)
    return mats.reshape(KH, (width + 2) * Cin, width * Cout).astype(jnp.bfloat16)


@jax.jit
def conv_block(x_nchw, w1, b1, g1, be1, w2, b2, g2, be2):
    """x_nchw: (N, Cin, H, W) f32; w*: PyTorch OIHW; b*/g*/be*: (Cout,)."""
    N, Cin, H, W = x_nchw.shape
    Cout = w1.shape[0]

    # Conv biases are mathematically no-ops under training-mode BatchNorm
    # (the mean subtraction cancels per-channel constants) -> not sent to the kernel.
    del b1, b2

    # NCHW -> NHWC, zero-pad spatially (Conv2d padding=1), fold channels into lanes.
    x = jnp.transpose(x_nchw, (0, 2, 3, 1))
    xp = jnp.pad(x, ((0, 0), (1, 1), (1, 1), (0, 0)))                  # (N, H+2, W+2, Cin)
    xp = xp.reshape(N, H + 2, (W + 2) * Cin)                           # lane-folded

    w1_b = _banded_weights(w1, W)                                      # (3, (W+2)*Cin,  W*Cout) bf16
    w2_b = _banded_weights(w2, W)                                      # (3, (W+2)*Cout, W*Cout) bf16

    g1_k, be1_k, g2_k, be2_k = (v.reshape(1, Cout).astype(jnp.float32)
                                for v in (g1, be1, g2, be2))

    vspec = pl.BlockSpec((1, Cout), lambda i: (0, 0))

    out2d = pl.pallas_call(
        _conv_block_kernel,
        out_shape=jax.ShapeDtypeStruct((N * H, W * Cout), jnp.float32),
        grid_spec=pltpu.PrefetchScalarGridSpec(
            num_scalar_prefetch=0,
            # Batch-stat BatchNorm couples the whole (N, H, W) extent -> one step.
            grid=(1,),
            in_specs=[
                pl.BlockSpec((N, H + 2, (W + 2) * Cin), lambda i: (0, 0, 0)),
                pl.BlockSpec((3, (W + 2) * Cin, W * Cout), lambda i: (0, 0, 0)),
                vspec, vspec,
                pl.BlockSpec((3, (W + 2) * Cout, W * Cout), lambda i: (0, 0, 0)),
                vspec, vspec,
            ],
            out_specs=pl.BlockSpec((N * H, W * Cout), lambda i: (0, 0)),
            scratch_shapes=[pltpu.VMEM((N, H + 2, (W + 2) * Cout), jnp.bfloat16)],
        ),
        compiler_params=pltpu.CompilerParams(
            dimension_semantics=("arbitrary",),
            vmem_limit_bytes=32 * 1024 * 1024,
        ),
    )(xp, w1_b, g1_k, be1_k, w2_b, g2_k, be2_k)

    out = out2d.reshape(N, H, W, Cout)
    return jnp.transpose(out, (0, 3, 1, 2))                            # back to NCHW


# ---------------------------- pure-JAX reference ------------------------------

def conv_block_ref(x, w1, b1, g1, be1, w2, b2, g2, be2, *, bf16_matmul=False):
    """NCHW reference.  bf16_matmul=True mirrors the kernel's MXU operand
    rounding (bf16 multiplicands, f32 accumulation)."""
    def conv(inp, w, b):
        lhs, rhs = inp, w
        if bf16_matmul:
            lhs = lhs.astype(jnp.bfloat16)
            rhs = rhs.astype(jnp.bfloat16)
        y = jax.lax.conv_general_dilated(
            lhs, rhs, window_strides=(1, 1), padding=((1, 1), (1, 1)),
            dimension_numbers=("NCHW", "OIHW", "NCHW"),
            preferred_element_type=jnp.float32)
        return y + b.reshape(1, -1, 1, 1)

    def bn_relu(y, g, be):
        mean = jnp.mean(y, axis=(0, 2, 3), keepdims=True)
        var = jnp.mean((y - mean) ** 2, axis=(0, 2, 3), keepdims=True)
        yn = (y - mean) * jax.lax.rsqrt(var + EPS)
        return jnp.maximum(yn * g.reshape(1, -1, 1, 1) + be.reshape(1, -1, 1, 1), 0.0)

    h = bn_relu(conv(x, w1, b1), g1, be1)
    return bn_relu(conv(h, w2, b2), g2, be2)


if __name__ == "__main__":
    N, Cin, Cout, H, W = 2, 4, 8, 16, 16
    keys = jax.random.split(jax.random.PRNGKey(0), 9)

    x   = jax.random.normal(keys[0], (N, Cin, H, W), jnp.float32)
    w1  = jax.random.normal(keys[1], (Cout, Cin, 3, 3), jnp.float32) * 0.1
    b1  = jax.random.normal(keys[2], (Cout,), jnp.float32) * 0.1
    g1  = 1.0 + 0.1 * jax.random.normal(keys[3], (Cout,), jnp.float32)
    be1 = 0.1 * jax.random.normal(keys[4], (Cout,), jnp.float32)
    w2  = jax.random.normal(keys[5], (Cout, Cout, 3, 3), jnp.float32) * 0.1
    b2  = jax.random.normal(keys[6], (Cout,), jnp.float32) * 0.1
    g2  = 1.0 + 0.1 * jax.random.normal(keys[7], (Cout,), jnp.float32)
    be2 = 0.1 * jax.random.normal(keys[8], (Cout,), jnp.float32)

    params = (w1, b1, g1, be1, w2, b2, g2, be2)

    out = jax.block_until_ready(conv_block(x, *params))
    assert out.shape == (N, Cout, H, W)

    # Tight check vs a reference using the same bf16 matmul-operand rounding
    # (biases present in the reference; exactly canceled by training-mode BN).
    ref_bf16 = jax.block_until_ready(conv_block_ref(x, *params, bf16_matmul=True))
    assert jnp.allclose(out, ref_bf16, atol=5e-3, rtol=5e-3), \
        "mismatch vs bf16-matmul reference"

    # Loose sanity check vs the full-f32 reference (bf16 rounding is the only delta).
    ref_f32 = jax.block_until_ready(conv_block_ref(x, *params, bf16_matmul=False))
    assert jnp.allclose(out, ref_f32, atol=1e-1, rtol=1e-1), \
        "mismatch vs f32 reference"

    print("KERNEL_OK")
</pallas_src>

<mosaic_0001>
module attributes {stable_mosaic.version = 11 : i64} {
  func.func @_conv_block_kernel(%arg0: i32, %arg1: memref<2x18x72xf32, #tpu.memory_space<vmem>>, %arg2: memref<3x72x128xbf16, #tpu.memory_space<vmem>>, %arg3: memref<1x8xf32, #tpu.memory_space<vmem>>, %arg4: memref<1x8xf32, #tpu.memory_space<vmem>>, %arg5: memref<3x144x128xbf16, #tpu.memory_space<vmem>>, %arg6: memref<1x8xf32, #tpu.memory_space<vmem>>, %arg7: memref<1x8xf32, #tpu.memory_space<vmem>>, %arg8: memref<32x128xf32, #tpu.memory_space<vmem>>, %arg9: memref<2x18x144xbf16, #tpu.memory_space<vmem>>) attributes {dimension_semantics = [#tpu.dimension_semantics<arbitrary>], iteration_bounds = array<i64: 1>, scalar_prefetch = 0 : i64, scratch_operands = 1 : i64, tpu.core_type = #tpu.core_type<tc>, window_params = [{pipeline_mode = #tpu.pipeline_mode<synchronous>, transform_indices = @transform_0, window_bounds = array<i64: 2, 18, 72>}, {pipeline_mode = #tpu.pipeline_mode<synchronous>, transform_indices = @transform_1, window_bounds = array<i64: 3, 72, 128>}, {pipeline_mode = #tpu.pipeline_mode<synchronous>, transform_indices = @transform_2, window_bounds = array<i64: 1, 8>}, {pipeline_mode = #tpu.pipeline_mode<synchronous>, transform_indices = @transform_3, window_bounds = array<i64: 1, 8>}, {pipeline_mode = #tpu.pipeline_mode<synchronous>, transform_indices = @transform_4, window_bounds = array<i64: 3, 144, 128>}, {pipeline_mode = #tpu.pipeline_mode<synchronous>, transform_indices = @transform_5, window_bounds = array<i64: 1, 8>}, {pipeline_mode = #tpu.pipeline_mode<synchronous>, transform_indices = @transform_6, window_bounds = array<i64: 1, 8>}, {pipeline_mode = #tpu.pipeline_mode<synchronous>, transform_indices = @transform_7, window_bounds = array<i64: 32, 128>}]} {
    %cst = arith.constant 0.000000e+00 : f32
    %0 = vector.broadcast %cst : f32 to vector<32x128xf32>
    %c0 = arith.constant 0 : index
    %c0_0 = arith.constant 0 : index
    %c0_1 = arith.constant 0 : index
    %1 = vector.load %arg1[%c0, %c0_0, %c0_1] : memref<2x18x72xf32, #tpu.memory_space<vmem>>, vector<2x16x72xf32>
    %2 = vector.shape_cast %1 : vector<2x16x72xf32> to vector<32x72xf32>
    %3 = arith.truncf %2 : vector<32x72xf32> to vector<32x72xbf16>
    %c0_2 = arith.constant 0 : index
    %c0_3 = arith.constant 0 : index
    %c0_4 = arith.constant 0 : index
    %4 = vector.load %arg2[%c0_2, %c0_3, %c0_4] : memref<3x72x128xbf16, #tpu.memory_space<vmem>>, vector<1x72x128xbf16>
    %5 = vector.shape_cast %4 : vector<1x72x128xbf16> to vector<72x128xbf16>
    %cst_5 = arith.constant dense<0.000000e+00> : vector<32x128xf32>
    %6 = tpu.matmul %3, %5, %cst_5 {dimension_numbers = #tpu.dot_dimension_numbers<[1], [0], [0], [1], [0, 0, 1, 1], [], []>} : vector<32x72xbf16>, vector<72x128xbf16>, vector<32x128xf32> -> vector<32x128xf32>
    %7 = arith.addf %0, %6 : vector<32x128xf32>
    %c0_6 = arith.constant 0 : index
    %c1 = arith.constant 1 : index
    %c0_7 = arith.constant 0 : index
    %8 = vector.load %arg1[%c0_6, %c1, %c0_7] : memref<2x18x72xf32, #tpu.memory_space<vmem>>, vector<2x16x72xf32>
    %9 = vector.shape_cast %8 : vector<2x16x72xf32> to vector<32x72xf32>
    %10 = arith.truncf %9 : vector<32x72xf32> to vector<32x72xbf16>
    %c1_8 = arith.constant 1 : index
    %c0_9 = arith.constant 0 : index
    %c0_10 = arith.constant 0 : index
    %11 = vector.load %arg2[%c1_8, %c0_9, %c0_10] : memref<3x72x128xbf16, #tpu.memory_space<vmem>>, vector<1x72x128xbf16>
    %12 = vector.shape_cast %11 : vector<1x72x128xbf16> to vector<72x128xbf16>
    %cst_11 = arith.constant dense<0.000000e+00> : vector<32x128xf32>
    %13 = tpu.matmul %10, %12, %cst_11 {dimension_numbers = #tpu.dot_dimension_numbers<[1], [0], [0], [1], [0, 0, 1, 1], [], []>} : vector<32x72xbf16>, vector<72x128xbf16>, vector<32x128xf32> -> vector<32x128xf32>
    %14 = arith.addf %7, %13 : vector<32x128xf32>
    %c0_12 = arith.constant 0 : index
    %c2 = arith.constant 2 : index
    %c0_13 = arith.constant 0 : index
    %15 = vector.load %arg1[%c0_12, %c2, %c0_13] : memref<2x18x72xf32, #tpu.memory_space<vmem>>, vector<2x16x72xf32>
    %16 = vector.shape_cast %15 : vector<2x16x72xf32> to vector<32x72xf32>
    %17 = arith.truncf %16 : vector<32x72xf32> to vector<32x72xbf16>
    %c2_14 = arith.constant 2 : index
    %c0_15 = arith.constant 0 : index
    %c0_16 = arith.constant 0 : index
    %18 = vector.load %arg2[%c2_14, %c0_15, %c0_16] : memref<3x72x128xbf16, #tpu.memory_space<vmem>>, vector<1x72x128xbf16>
    %19 = vector.shape_cast %18 : vector<1x72x128xbf16> to vector<72x128xbf16>
    %cst_17 = arith.constant dense<0.000000e+00> : vector<32x128xf32>
    %20 = tpu.matmul %17, %19, %cst_17 {dimension_numbers = #tpu.dot_dimension_numbers<[1], [0], [0], [1], [0, 0, 1, 1], [], []>} : vector<32x72xbf16>, vector<72x128xbf16>, vector<32x128xf32> -> vector<32x128xf32>
    %21 = arith.addf %14, %20 : vector<32x128xf32>
    %c0_18 = arith.constant 0 : index
    %c0_19 = arith.constant 0 : index
    %22 = vector.load %arg3[%c0_18, %c0_19] : memref<1x8xf32, #tpu.memory_space<vmem>>, vector<1x8xf32>
    %c0_20 = arith.constant 0 : index
    %c0_21 = arith.constant 0 : index
    %23 = vector.load %arg4[%c0_20, %c0_21] : memref<1x8xf32, #tpu.memory_space<vmem>>, vector<1x8xf32>
    %cst_22 = arith.constant dense<0.000000e+00> : vector<128xf32>
    %24 = vector.multi_reduction <add>, %21, %cst_22 [0] : vector<32x128xf32> to vector<128xf32>
    %25 = vector.shape_cast %24 : vector<128xf32> to vector<1x128xf32>
    %26 = vector.extract_strided_slice %25 {offsets = [0, 0], sizes = [1, 8], strides = [1, 1]} : vector<1x128xf32> to vector<1x8xf32>
    %27 = vector.extract_strided_slice %25 {offsets = [0, 8], sizes = [1, 8], strides = [1, 1]} : vector<1x128xf32> to vector<1x8xf32>
    %28 = arith.addf %26, %27 : vector<1x8xf32>
    %29 = vector.extract_strided_slice %25 {offsets = [0, 16], sizes = [1, 8], strides = [1, 1]} : vector<1x128xf32> to vector<1x8xf32>
    %30 = arith.addf %28, %29 : vector<1x8xf32>
    %31 = vector.extract_strided_slice %25 {offsets = [0, 24], sizes = [1, 8], strides = [1, 1]} : vector<1x128xf32> to vector<1x8xf32>
    %32 = arith.addf %30, %31 : vector<1x8xf32>
    %33 = vector.extract_strided_slice %25 {offsets = [0, 32], sizes = [1, 8], strides = [1, 1]} : vector<1x128xf32> to vector<1x8xf32>
    %34 = arith.addf %32, %33 : vector<1x8xf32>
    %35 = vector.extract_strided_slice %25 {offsets = [0, 40], sizes = [1, 8], strides = [1, 1]} : vector<1x128xf32> to vector<1x8xf32>
    %36 = arith.addf %34, %35 : vector<1x8xf32>
    %37 = vector.extract_strided_slice %25 {offsets = [0, 48], sizes = [1, 8], strides = [1, 1]} : vector<1x128xf32> to vector<1x8xf32>
    %38 = arith.addf %36, %37 : vector<1x8xf32>
    %39 = vector.extract_strided_slice %25 {offsets = [0, 56], sizes = [1, 8], strides = [1, 1]} : vector<1x128xf32> to vector<1x8xf32>
    %40 = arith.addf %38, %39 : vector<1x8xf32>
    %41 = vector.extract_strided_slice %25 {offsets = [0, 64], sizes = [1, 8], strides = [1, 1]} : vector<1x128xf32> to vector<1x8xf32>
    %42 = arith.addf %40, %41 : vector<1x8xf32>
    %43 = vector.extract_strided_slice %25 {offsets = [0, 72], sizes = [1, 8], strides = [1, 1]} : vector<1x128xf32> to vector<1x8xf32>
    %44 = arith.addf %42, %43 : vector<1x8xf32>
    %45 = vector.extract_strided_slice %25 {offsets = [0, 80], sizes = [1, 8], strides = [1, 1]} : vector<1x128xf32> to vector<1x8xf32>
    %46 = arith.addf %44, %45 : vector<1x8xf32>
    %47 = vector.extract_strided_slice %25 {offsets = [0, 88], sizes = [1, 8], strides = [1, 1]} : vector<1x128xf32> to vector<1x8xf32>
    %48 = arith.addf %46, %47 : vector<1x8xf32>
    %49 = vector.extract_strided_slice %25 {offsets = [0, 96], sizes = [1, 8], strides = [1, 1]} : vector<1x128xf32> to vector<1x8xf32>
    %50 = arith.addf %48, %49 : vector<1x8xf32>
    %51 = vector.extract_strided_slice %25 {offsets = [0, 104], sizes = [1, 8], strides = [1, 1]} : vector<1x128xf32> to vector<1x8xf32>
    %52 = arith.addf %50, %51 : vector<1x8xf32>
    %53 = vector.extract_strided_slice %25 {offsets = [0, 112], sizes = [1, 8], strides = [1, 1]} : vector<1x128xf32> to vector<1x8xf32>
    %54 = arith.addf %52, %53 : vector<1x8xf32>
    %55 = vector.extract_strided_slice %25 {offsets = [0, 120], sizes = [1, 8], strides = [1, 1]} : vector<1x128xf32> to vector<1x8xf32>
    %56 = arith.addf %54, %55 : vector<1x8xf32>
    %cst_23 = arith.constant 0.001953125 : f32
    %57 = vector.broadcast %cst_23 : f32 to vector<1x8xf32>
    %58 = arith.mulf %56, %57 : vector<1x8xf32>
    %59 = tpu.concatenate %58, %58, %58, %58, %58, %58, %58, %58, %58, %58, %58, %58, %58, %58, %58, %58 in 1 : vector<1x8xf32>, vector<1x8xf32>, vector<1x8xf32>, vector<1x8xf32>, vector<1x8xf32>, vector<1x8xf32>, vector<1x8xf32>, vector<1x8xf32>, vector<1x8xf32>, vector<1x8xf32>, vector<1x8xf32>, vector<1x8xf32>, vector<1x8xf32>, vector<1x8xf32>, vector<1x8xf32>, vector<1x8xf32> -> vector<1x128xf32>
    %60 = vector.broadcast %59 : vector<1x128xf32> to vector<32x128xf32>
    %61 = arith.subf %21, %60 : vector<32x128xf32>
    %62 = arith.mulf %61, %61 : vector<32x128xf32>
    %cst_24 = arith.constant dense<0.000000e+00> : vector<128xf32>
    %63 = vector.multi_reduction <add>, %62, %cst_24 [0] : vector<32x128xf32> to vector<128xf32>
    %64 = vector.shape_cast %63 : vector<128xf32> to vector<1x128xf32>
    %65 = vector.extract_strided_slice %64 {offsets = [0, 0], sizes = [1, 8], strides = [1, 1]} : vector<1x128xf32> to vector<1x8xf32>
    %66 = vector.extract_strided_slice %64 {offsets = [0, 8], sizes = [1, 8], strides = [1, 1]} : vector<1x128xf32> to vector<1x8xf32>
    %67 = arith.addf %65, %66 : vector<1x8xf32>
    %68 = vector.extract_strided_slice %64 {offsets = [0, 16], sizes = [1, 8], strides = [1, 1]} : vector<1x128xf32> to vector<1x8xf32>
    %69 = arith.addf %67, %68 : vector<1x8xf32>
    %70 = vector.extract_strided_slice %64 {offsets = [0, 24], sizes = [1, 8], strides = [1, 1]} : vector<1x128xf32> to vector<1x8xf32>
    %71 = arith.addf %69, %70 : vector<1x8xf32>
    %72 = vector.extract_strided_slice %64 {offsets = [0, 32], sizes = [1, 8], strides = [1, 1]} : vector<1x128xf32> to vector<1x8xf32>
    %73 = arith.addf %71, %72 : vector<1x8xf32>
    %74 = vector.extract_strided_slice %64 {offsets = [0, 40], sizes = [1, 8], strides = [1, 1]} : vector<1x128xf32> to vector<1x8xf32>
    %75 = arith.addf %73, %74 : vector<1x8xf32>
    %76 = vector.extract_strided_slice %64 {offsets = [0, 48], sizes = [1, 8], strides = [1, 1]} : vector<1x128xf32> to vector<1x8xf32>
    %77 = arith.addf %75, %76 : vector<1x8xf32>
    %78 = vector.extract_strided_slice %64 {offsets = [0, 56], sizes = [1, 8], strides = [1, 1]} : vector<1x128xf32> to vector<1x8xf32>
    %79 = arith.addf %77, %78 : vector<1x8xf32>
    %80 = vector.extract_strided_slice %64 {offsets = [0, 64], sizes = [1, 8], strides = [1, 1]} : vector<1x128xf32> to vector<1x8xf32>
    %81 = arith.addf %79, %80 : vector<1x8xf32>
    %82 = vector.extract_strided_slice %64 {offsets = [0, 72], sizes = [1, 8], strides = [1, 1]} : vector<1x128xf32> to vector<1x8xf32>
    %83 = arith.addf %81, %82 : vector<1x8xf32>
    %84 = vector.extract_strided_slice %64 {offsets = [0, 80], sizes = [1, 8], strides = [1, 1]} : vector<1x128xf32> to vector<1x8xf32>
    %85 = arith.addf %83, %84 : vector<1x8xf32>
    %86 = vector.extract_strided_slice %64 {offsets = [0, 88], sizes = [1, 8], strides = [1, 1]} : vector<1x128xf32> to vector<1x8xf32>
    %87 = arith.addf %85, %86 : vector<1x8xf32>
    %88 = vector.extract_strided_slice %64 {offsets = [0, 96], sizes = [1, 8], strides = [1, 1]} : vector<1x128xf32> to vector<1x8xf32>
    %89 = arith.addf %87, %88 : vector<1x8xf32>
    %90 = vector.extract_strided_slice %64 {offsets = [0, 104], sizes = [1, 8], strides = [1, 1]} : vector<1x128xf32> to vector<1x8xf32>
    %91 = arith.addf %89, %90 : vector<1x8xf32>
    %92 = vector.extract_strided_slice %64 {offsets = [0, 112], sizes = [1, 8], strides = [1, 1]} : vector<1x128xf32> to vector<1x8xf32>
    %93 = arith.addf %91, %92 : vector<1x8xf32>
    %94 = vector.extract_strided_slice %64 {offsets = [0, 120], sizes = [1, 8], strides = [1, 1]} : vector<1x128xf32> to vector<1x8xf32>
    %95 = arith.addf %93, %94 : vector<1x8xf32>
    %cst_25 = arith.constant 0.001953125 : f32
    %96 = vector.broadcast %cst_25 : f32 to vector<1x8xf32>
    %97 = arith.mulf %95, %96 : vector<1x8xf32>
    %cst_26 = arith.constant 9.99999974E-6 : f32
    %98 = vector.broadcast %cst_26 : f32 to vector<1x8xf32>
    %99 = arith.addf %97, %98 : vector<1x8xf32>
    %100 = math.rsqrt %99 : vector<1x8xf32>
    %101 = arith.mulf %22, %100 : vector<1x8xf32>
    %102 = tpu.concatenate %101, %101, %101, %101, %101, %101, %101, %101, %101, %101, %101, %101, %101, %101, %101, %101 in 1 : vector<1x8xf32>, vector<1x8xf32>, vector<1x8xf32>, vector<1x8xf32>, vector<1x8xf32>, vector<1x8xf32>, vector<1x8xf32>, vector<1x8xf32>, vector<1x8xf32>, vector<1x8xf32>, vector<1x8xf32>, vector<1x8xf32>, vector<1x8xf32>, vector<1x8xf32>, vector<1x8xf32>, vector<1x8xf32> -> vector<1x128xf32>
    %103 = vector.broadcast %102 : vector<1x128xf32> to vector<32x128xf32>
    %104 = arith.mulf %61, %103 : vector<32x128xf32>
    %105 = tpu.concatenate %23, %23, %23, %23, %23, %23, %23, %23, %23, %23, %23, %23, %23, %23, %23, %23 in 1 : vector<1x8xf32>, vector<1x8xf32>, vector<1x8xf32>, vector<1x8xf32>, vector<1x8xf32>, vector<1x8xf32>, vector<1x8xf32>, vector<1x8xf32>, vector<1x8xf32>, vector<1x8xf32>, vector<1x8xf32>, vector<1x8xf32>, vector<1x8xf32>, vector<1x8xf32>, vector<1x8xf32>, vector<1x8xf32> -> vector<1x128xf32>
    %106 = vector.broadcast %105 : vector<1x128xf32> to vector<32x128xf32>
    %107 = arith.addf %104, %106 : vector<32x128xf32>
    %cst_27 = arith.constant 0.000000e+00 : f32
    %108 = vector.broadcast %cst_27 : f32 to vector<32x128xf32>
    %109 = arith.maximumf %107, %108 : vector<32x128xf32>
    %cst_28 = arith.constant 0.000000e+00 : bf16
    %110 = vector.broadcast %cst_28 : bf16 to vector<2x1x144xbf16>
    %cst_29 = arith.constant 0.000000e+00 : bf16
    %111 = vector.broadcast %cst_29 : bf16 to vector<2x16x8xbf16>
    %c0_30 = arith.constant 0 : index
    %c0_31 = arith.constant 0 : index
    %c0_32 = arith.constant 0 : index
    %112 = vector.load %arg9[%c0_30, %c0_31, %c0_32] : memref<2x18x144xbf16, #tpu.memory_space<vmem>>, vector<2x1x144xbf16>
    tpu.vector_store %arg9[%c0_30, %c0_31, %c0_32], %110 {strides = array<i32>} : memref<2x18x144xbf16, #tpu.memory_space<vmem>>, vector<2x1x144xbf16>,
    %c0_33 = arith.constant 0 : index
    %c17 = arith.constant 17 : index
    %c0_34 = arith.constant 0 : index
    %113 = vector.load %arg9[%c0_33, %c17, %c0_34] : memref<2x18x144xbf16, #tpu.memory_space<vmem>>, vector<2x1x144xbf16>
    tpu.vector_store %arg9[%c0_33, %c17, %c0_34], %110 {strides = array<i32>} : memref<2x18x144xbf16, #tpu.memory_space<vmem>>, vector<2x1x144xbf16>,
    %c0_35 = arith.constant 0 : index
    %c1_36 = arith.constant 1 : index
    %c0_37 = arith.constant 0 : index
    %114 = vector.load %arg9[%c0_35, %c1_36, %c0_37] : memref<2x18x144xbf16, #tpu.memory_space<vmem>>, vector<2x16x8xbf16>
    tpu.vector_store %arg9[%c0_35, %c1_36, %c0_37], %111 {strides = array<i32>} : memref<2x18x144xbf16, #tpu.memory_space<vmem>>, vector<2x16x8xbf16>,
    %c0_38 = arith.constant 0 : index
    %c1_39 = arith.constant 1 : index
    %c136 = arith.constant 136 : index
    %115 = vector.load %arg9[%c0_38, %c1_39, %c136] : memref<2x18x144xbf16, #tpu.memory_space<vmem>>, vector<2x16x8xbf16>
    tpu.vector_store %arg9[%c0_38, %c1_39, %c136], %111 {strides = array<i32>} : memref<2x18x144xbf16, #tpu.memory_space<vmem>>, vector<2x16x8xbf16>,
    %116 = arith.truncf %109 : vector<32x128xf32> to vector<32x128xbf16>
    %117 = vector.shape_cast %116 : vector<32x128xbf16> to vector<2x16x128xbf16>
    %c0_40 = arith.constant 0 : index
    %c1_41 = arith.constant 1 : index
    %c8 = arith.constant 8 : index
    %118 = vector.load %arg9[%c0_40, %c1_41, %c8] : memref<2x18x144xbf16, #tpu.memory_space<vmem>>, vector<2x16x128xbf16>
    tpu.vector_store %arg9[%c0_40, %c1_41, %c8], %117 {strides = array<i32>} : memref<2x18x144xbf16, #tpu.memory_space<vmem>>, vector<2x16x128xbf16>,
    %cst_42 = arith.constant 0.000000e+00 : f32
    %119 = vector.broadcast %cst_42 : f32 to vector<32x128xf32>
    %c0_43 = arith.constant 0 : index
    %c0_44 = arith.constant 0 : index
    %c0_45 = arith.constant 0 : index
    %120 = vector.load %arg9[%c0_43, %c0_44, %c0_45] : memref<2x18x144xbf16, #tpu.memory_space<vmem>>, vector<2x16x144xbf16>
    %121 = vector.shape_cast %120 : vector<2x16x144xbf16> to vector<32x144xbf16>
    %c0_46 = arith.constant 0 : index
    %c0_47 = arith.constant 0 : index
    %c0_48 = arith.constant 0 : index
    %122 = vector.load %arg5[%c0_46, %c0_47, %c0_48] : memref<3x144x128xbf16, #tpu.memory_space<vmem>>, vector<1x144x128xbf16>
    %123 = vector.shape_cast %122 : vector<1x144x128xbf16> to vector<144x128xbf16>
    %cst_49 = arith.constant dense<0.000000e+00> : vector<32x128xf32>
    %124 = tpu.matmul %121, %123, %cst_49 {dimension_numbers = #tpu.dot_dimension_numbers<[1], [0], [0], [1], [0, 0, 1, 1], [], []>} : vector<32x144xbf16>, vector<144x128xbf16>, vector<32x128xf32> -> vector<32x128xf32>
    %125 = arith.addf %119, %124 : vector<32x128xf32>
    %c0_50 = arith.constant 0 : index
    %c1_51 = arith.constant 1 : index
    %c0_52 = arith.constant 0 : index
    %126 = vector.load %arg9[%c0_50, %c1_51, %c0_52] : memref<2x18x144xbf16, #tpu.memory_space<vmem>>, vector<2x16x144xbf16>
    %127 = vector.shape_cast %126 : vector<2x16x144xbf16> to vector<32x144xbf16>
    %c1_53 = arith.constant 1 : index
    %c0_54 = arith.constant 0 : index
    %c0_55 = arith.constant 0 : index
    %128 = vector.load %arg5[%c1_53, %c0_54, %c0_55] : memref<3x144x128xbf16, #tpu.memory_space<vmem>>, vector<1x144x128xbf16>
    %129 = vector.shape_cast %128 : vector<1x144x128xbf16> to vector<144x128xbf16>
    %cst_56 = arith.constant dense<0.000000e+00> : vector<32x128xf32>
    %130 = tpu.matmul %127, %129, %cst_56 {dimension_numbers = #tpu.dot_dimension_numbers<[1], [0], [0], [1], [0, 0, 1, 1], [], []>} : vector<32x144xbf16>, vector<144x128xbf16>, vector<32x128xf32> -> vector<32x128xf32>
    %131 = arith.addf %125, %130 : vector<32x128xf32>
    %c0_57 = arith.constant 0 : index
    %c2_58 = arith.constant 2 : index
    %c0_59 = arith.constant 0 : index
    %132 = vector.load %arg9[%c0_57, %c2_58, %c0_59] : memref<2x18x144xbf16, #tpu.memory_space<vmem>>, vector<2x16x144xbf16>
    %133 = vector.shape_cast %132 : vector<2x16x144xbf16> to vector<32x144xbf16>
    %c2_60 = arith.constant 2 : index
    %c0_61 = arith.constant 0 : index
    %c0_62 = arith.constant 0 : index
    %134 = vector.load %arg5[%c2_60, %c0_61, %c0_62] : memref<3x144x128xbf16, #tpu.memory_space<vmem>>, vector<1x144x128xbf16>
    %135 = vector.shape_cast %134 : vector<1x144x128xbf16> to vector<144x128xbf16>
    %cst_63 = arith.constant dense<0.000000e+00> : vector<32x128xf32>
    %136 = tpu.matmul %133, %135, %cst_63 {dimension_numbers = #tpu.dot_dimension_numbers<[1], [0], [0], [1], [0, 0, 1, 1], [], []>} : vector<32x144xbf16>, vector<144x128xbf16>, vector<32x128xf32> -> vector<32x128xf32>
    %137 = arith.addf %131, %136 : vector<32x128xf32>
    %c0_64 = arith.constant 0 : index
    %c0_65 = arith.constant 0 : index
    %138 = vector.load %arg6[%c0_64, %c0_65] : memref<1x8xf32, #tpu.memory_space<vmem>>, vector<1x8xf32>
    %c0_66 = arith.constant 0 : index
    %c0_67 = arith.constant 0 : index
    %139 = vector.load %arg7[%c0_66, %c0_67] : memref<1x8xf32, #tpu.memory_space<vmem>>, vector<1x8xf32>
    %cst_68 = arith.constant dense<0.000000e+00> : vector<128xf32>
    %140 = vector.multi_reduction <add>, %137, %cst_68 [0] : vector<32x128xf32> to vector<128xf32>
    %141 = vector.shape_cast %140 : vector<128xf32> to vector<1x128xf32>
    %142 = vector.extract_strided_slice %141 {offsets = [0, 0], sizes = [1, 8], strides = [1, 1]} : vector<1x128xf32> to vector<1x8xf32>
    %143 = vector.extract_strided_slice %141 {offsets = [0, 8], sizes = [1, 8], strides = [1, 1]} : vector<1x128xf32> to vector<1x8xf32>
    %144 = arith.addf %142, %143 : vector<1x8xf32>
    %145 = vector.extract_strided_slice %141 {offsets = [0, 16], sizes = [1, 8], strides = [1, 1]} : vector<1x128xf32> to vector<1x8xf32>
    %146 = arith.addf %144, %145 : vector<1x8xf32>
    %147 = vector.extract_strided_slice %141 {offsets = [0, 24], sizes = [1, 8], strides = [1, 1]} : vector<1x128xf32> to vector<1x8xf32>
    %148 = arith.addf %146, %147 : vector<1x8xf32>
    %149 = vector.extract_strided_slice %141 {offsets = [0, 32], sizes = [1, 8], strides = [1, 1]} : vector<1x128xf32> to vector<1x8xf32>
    %150 = arith.addf %148, %149 : vector<1x8xf32>
    %151 = vector.extract_strided_slice %141 {offsets = [0, 40], sizes = [1, 8], strides = [1, 1]} : vector<1x128xf32> to vector<1x8xf32>
    %152 = arith.addf %150, %151 : vector<1x8xf32>
    %153 = vector.extract_strided_slice %141 {offsets = [0, 48], sizes = [1, 8], strides = [1, 1]} : vector<1x128xf32> to vector<1x8xf32>
    %154 = arith.addf %152, %153 : vector<1x8xf32>
    %155 = vector.extract_strided_slice %141 {offsets = [0, 56], sizes = [1, 8], strides = [1, 1]} : vector<1x128xf32> to vector<1x8xf32>
    %156 = arith.addf %154, %155 : vector<1x8xf32>
    %157 = vector.extract_strided_slice %141 {offsets = [0, 64], sizes = [1, 8], strides = [1, 1]} : vector<1x128xf32> to vector<1x8xf32>
    %158 = arith.addf %156, %157 : vector<1x8xf32>
    %159 = vector.extract_strided_slice %141 {offsets = [0, 72], sizes = [1, 8], strides = [1, 1]} : vector<1x128xf32> to vector<1x8xf32>
    %160 = arith.addf %158, %159 : vector<1x8xf32>
    %161 = vector.extract_strided_slice %141 {offsets = [0, 80], sizes = [1, 8], strides = [1, 1]} : vector<1x128xf32> to vector<1x8xf32>
    %162 = arith.addf %160, %161 : vector<1x8xf32>
    %163 = vector.extract_strided_slice %141 {offsets = [0, 88], sizes = [1, 8], strides = [1, 1]} : vector<1x128xf32> to vector<1x8xf32>
    %164 = arith.addf %162, %163 : vector<1x8xf32>
    %165 = vector.extract_strided_slice %141 {offsets = [0, 96], sizes = [1, 8], strides = [1, 1]} : vector<1x128xf32> to vector<1x8xf32>
    %166 = arith.addf %164, %165 : vector<1x8xf32>
    %167 = vector.extract_strided_slice %141 {offsets = [0, 104], sizes = [1, 8], strides = [1, 1]} : vector<1x128xf32> to vector<1x8xf32>
    %168 = arith.addf %166, %167 : vector<1x8xf32>
    %169 = vector.extract_strided_slice %141 {offsets = [0, 112], sizes = [1, 8], strides = [1, 1]} : vector<1x128xf32> to vector<1x8xf32>
    %170 = arith.addf %168, %169 : vector<1x8xf32>
    %171 = vector.extract_strided_slice %141 {offsets = [0, 120], sizes = [1, 8], strides = [1, 1]} : vector<1x128xf32> to vector<1x8xf32>
    %172 = arith.addf %170, %171 : vector<1x8xf32>
    %cst_69 = arith.constant 0.001953125 : f32
    %173 = vector.broadcast %cst_69 : f32 to vector<1x8xf32>
    %174 = arith.mulf %172, %173 : vector<1x8xf32>
    %175 = tpu.concatenate %174, %174, %174, %174, %174, %174, %174, %174, %174, %174, %174, %174, %174, %174, %174, %174 in 1 : vector<1x8xf32>, vector<1x8xf32>, vector<1x8xf32>, vector<1x8xf32>, vector<1x8xf32>, vector<1x8xf32>, vector<1x8xf32>, vector<1x8xf32>, vector<1x8xf32>, vector<1x8xf32>, vector<1x8xf32>, vector<1x8xf32>, vector<1x8xf32>, vector<1x8xf32>, vector<1x8xf32>, vector<1x8xf32> -> vector<1x128xf32>
    %176 = vector.broadcast %175 : vector<1x128xf32> to vector<32x128xf32>
    %177 = arith.subf %137, %176 : vector<32x128xf32>
    %178 = arith.mulf %177, %177 : vector<32x128xf32>
    %cst_70 = arith.constant dense<0.000000e+00> : vector<128xf32>
    %179 = vector.multi_reduction <add>, %178, %cst_70 [0] : vector<32x128xf32> to vector<128xf32>
    %180 = vector.shape_cast %179 : vector<128xf32> to vector<1x128xf32>
    %181 = vector.extract_strided_slice %180 {offsets = [0, 0], sizes = [1, 8], strides = [1, 1]} : vector<1x128xf32> to vector<1x8xf32>
    %182 = vector.extract_strided_slice %180 {offsets = [0, 8], sizes = [1, 8], strides = [1, 1]} : vector<1x128xf32> to vector<1x8xf32>
    %183 = arith.addf %181, %182 : vector<1x8xf32>
    %184 = vector.extract_strided_slice %180 {offsets = [0, 16], sizes = [1, 8], strides = [1, 1]} : vector<1x128xf32> to vector<1x8xf32>
    %185 = arith.addf %183, %184 : vector<1x8xf32>
    %186 = vector.extract_strided_slice %180 {offsets = [0, 24], sizes = [1, 8], strides = [1, 1]} : vector<1x128xf32> to vector<1x8xf32>
    %187 = arith.addf %185, %186 : vector<1x8xf32>
    %188 = vector.extract_strided_slice %180 {offsets = [0, 32], sizes = [1, 8], strides = [1, 1]} : vector<1x128xf32> to vector<1x8xf32>
    %189 = arith.addf %187, %188 : vector<1x8xf32>
    %190 = vector.extract_strided_slice %180 {offsets = [0, 40], sizes = [1, 8], strides = [1, 1]} : vector<1x128xf32> to vector<1x8xf32>
    %191 = arith.addf %189, %190 : vector<1x8xf32>
    %192 = vector.extract_strided_slice %180 {offsets = [0, 48], sizes = [1, 8], strides = [1, 1]} : vector<1x128xf32> to vector<1x8xf32>
    %193 = arith.addf %191, %192 : vector<1x8xf32>
    %194 = vector.extract_strided_slice %180 {offsets = [0, 56], sizes = [1, 8], strides = [1, 1]} : vector<1x128xf32> to vector<1x8xf32>
    %195 = arith.addf %193, %194 : vector<1x8xf32>
    %196 = vector.extract_strided_slice %180 {offsets = [0, 64], sizes = [1, 8], strides = [1, 1]} : vector<1x128xf32> to vector<1x8xf32>
    %197 = arith.addf %195, %196 : vector<1x8xf32>
    %198 = vector.extract_strided_slice %180 {offsets = [0, 72], sizes = [1, 8], strides = [1, 1]} : vector<1x128xf32> to vector<1x8xf32>
    %199 = arith.addf %197, %198 : vector<1x8xf32>
    %200 = vector.extract_strided_slice %180 {offsets = [0, 80], sizes = [1, 8], strides = [1, 1]} : vector<1x128xf32> to vector<1x8xf32>
    %201 = arith.addf %199, %200 : vector<1x8xf32>
    %202 = vector.extract_strided_slice %180 {offsets = [0, 88], sizes = [1, 8], strides = [1, 1]} : vector<1x128xf32> to vector<1x8xf32>
    %203 = arith.addf %201, %202 : vector<1x8xf32>
    %204 = vector.extract_strided_slice %180 {offsets = [0, 96], sizes = [1, 8], strides = [1, 1]} : vector<1x128xf32> to vector<1x8xf32>
    %205 = arith.addf %203, %204 : vector<1x8xf32>
    %206 = vector.extract_strided_slice %180 {offsets = [0, 104], sizes = [1, 8], strides = [1, 1]} : vector<1x128xf32> to vector<1x8xf32>
    %207 = arith.addf %205, %206 : vector<1x8xf32>
    %208 = vector.extract_strided_slice %180 {offsets = [0, 112], sizes = [1, 8], strides = [1, 1]} : vector<1x128xf32> to vector<1x8xf32>
    %209 = arith.addf %207, %208 : vector<1x8xf32>
    %210 = vector.extract_strided_slice %180 {offsets = [0, 120], sizes = [1, 8], strides = [1, 1]} : vector<1x128xf32> to vector<1x8xf32>
    %211 = arith.addf %209, %210 : vector<1x8xf32>
    %cst_71 = arith.constant 0.001953125 : f32
    %212 = vector.broadcast %cst_71 : f32 to vector<1x8xf32>
    %213 = arith.mulf %211, %212 : vector<1x8xf32>
    %cst_72 = arith.constant 9.99999974E-6 : f32
    %214 = vector.broadcast %cst_72 : f32 to vector<1x8xf32>
    %215 = arith.addf %213, %214 : vector<1x8xf32>
    %216 = math.rsqrt %215 : vector<1x8xf32>
    %217 = arith.mulf %138, %216 : vector<1x8xf32>
    %218 = tpu.concatenate %217, %217, %217, %217, %217, %217, %217, %217, %217, %217, %217, %217, %217, %217, %217, %217 in 1 : vector<1x8xf32>, vector<1x8xf32>, vector<1x8xf32>, vector<1x8xf32>, vector<1x8xf32>, vector<1x8xf32>, vector<1x8xf32>, vector<1x8xf32>, vector<1x8xf32>, vector<1x8xf32>, vector<1x8xf32>, vector<1x8xf32>, vector<1x8xf32>, vector<1x8xf32>, vector<1x8xf32>, vector<1x8xf32> -> vector<1x128xf32>
    %219 = vector.broadcast %218 : vector<1x128xf32> to vector<32x128xf32>
    %220 = arith.mulf %177, %219 : vector<32x128xf32>
    %221 = tpu.concatenate %139, %139, %139, %139, %139, %139, %139, %139, %139, %139, %139, %139, %139, %139, %139, %139 in 1 : vector<1x8xf32>, vector<1x8xf32>, vector<1x8xf32>, vector<1x8xf32>, vector<1x8xf32>, vector<1x8xf32>, vector<1x8xf32>, vector<1x8xf32>, vector<1x8xf32>, vector<1x8xf32>, vector<1x8xf32>, vector<1x8xf32>, vector<1x8xf32>, vector<1x8xf32>, vector<1x8xf32>, vector<1x8xf32> -> vector<1x128xf32>
    %222 = vector.broadcast %221 : vector<1x128xf32> to vector<32x128xf32>
    %223 = arith.addf %220, %222 : vector<32x128xf32>
    %cst_73 = arith.constant 0.000000e+00 : f32
    %224 = vector.broadcast %cst_73 : f32 to vector<32x128xf32>
    %225 = arith.maximumf %223, %224 : vector<32x128xf32>
    %c0_74 = arith.constant 0 : index
    %c0_75 = arith.constant 0 : index
    %226 = vector.load %arg8[%c0_74, %c0_75] : memref<32x128xf32, #tpu.memory_space<vmem>>, vector<32x128xf32>
    tpu.vector_store %arg8[%c0_74, %c0_75], %225 {strides = array<i32>} : memref<32x128xf32, #tpu.memory_space<vmem>>, vector<32x128xf32>,
    return
  }
  func.func @transform_0(%arg0: i32) -> (i32, i32, i32) {
    %c0_i32 = arith.constant 0 : i32
    %c0_i32_0 = arith.constant 0 : i32
    %c0_i32_1 = arith.constant 0 : i32
    %c0_i32_2 = arith.constant 0 : i32
    return %c0_i32, %c0_i32_0, %c0_i32_1 : i32, i32, i32
  }
  func.func @transform_1(%arg0: i32) -> (i32, i32, i32) {
    %c0_i32 = arith.constant 0 : i32
    %c0_i32_0 = arith.constant 0 : i32
    %c0_i32_1 = arith.constant 0 : i32
    %c0_i32_2 = arith.constant 0 : i32
    return %c0_i32, %c0_i32_0, %c0_i32_1 : i32, i32, i32
  }
  func.func @transform_2(%arg0: i32) -> (i32, i32) {
    %c0_i32 = arith.constant 0 : i32
    %c0_i32_0 = arith.constant 0 : i32
    %c0_i32_1 = arith.constant 0 : i32
    return %c0_i32, %c0_i32_0 : i32, i32
  }
  func.func @transform_3(%arg0: i32) -> (i32, i32) {
    %c0_i32 = arith.constant 0 : i32
    %c0_i32_0 = arith.constant 0 : i32
    %c0_i32_1 = arith.constant 0 : i32
    return %c0_i32, %c0_i32_0 : i32, i32
  }
  func.func @transform_4(%arg0: i32) -> (i32, i32, i32) {
    %c0_i32 = arith.constant 0 : i32
    %c0_i32_0 = arith.constant 0 : i32
    %c0_i32_1 = arith.constant 0 : i32
    %c0_i32_2 = arith.constant 0 : i32
    return %c0_i32, %c0_i32_0, %c0_i32_1 : i32, i32, i32
  }
  func.func @transform_5(%arg0: i32) -> (i32, i32) {
    %c0_i32 = arith.constant 0 : i32
    %c0_i32_0 = arith.constant 0 : i32
    %c0_i32_1 = arith.constant 0 : i32
    return %c0_i32, %c0_i32_0 : i32, i32
  }
  func.func @transform_6(%arg0: i32) -> (i32, i32) {
    %c0_i32 = arith.constant 0 : i32
    %c0_i32_0 = arith.constant 0 : i32
    %c0_i32_1 = arith.constant 0 : i32
    return %c0_i32, %c0_i32_0 : i32, i32
  }
  func.func @transform_7(%arg0: i32) -> (i32, i32) {
    %c0_i32 = arith.constant 0 : i32
    %c0_i32_0 = arith.constant 0 : i32
    %c0_i32_1 = arith.constant 0 : i32
    return %c0_i32, %c0_i32_0 : i32, i32
  }
}

</mosaic_0001>

<bundles_post_ra>
// kernel: conv_block.1
= control target key start
LH: loop header
LB: loop body
LE: loop exit
PB: predicated region body
PF: predicated region fallthrough
CT: control target
= control target key end

     0   :  { %vm92_vm0 = vcmask 1043456   ;;  %vm2885_vm1 = vcmask 588800   ;;  %s2038_s9 = smov 96   ;;  %s2039_s10 = smov 112   ;;  %vm2893_vm2 = vcmask 64512   ;;  %vm2892_vm3 = vcmask 130048   ;;  %s2871_s1 = inlined_call_operand.vmem [shape: bf16[3,72,128], index: 1, kind: input, shape index: {}]   ;;  %s2872_s0 = inlined_call_operand.vmem [shape: f32[2,18,72], index: 0, kind: input, shape index: {}]   ;;  %s2873_s3 = inlined_call_operand.vmem [shape: f32[1,8], index: 3, kind: input, shape index: {}]   ;;  %s2874_s2 = inlined_call_operand.vmem [shape: f32[1,8], index: 2, kind: input, shape index: {}]   ;;  %s2875_s4 = inlined_call_operand.vmem [shape: bf16[3,144,128], index: 4, kind: input, shape index: {}]   ;;  %s2876_s6 = inlined_call_operand.vmem [shape: f32[1,8], index: 6, kind: input, shape index: {}]   ;;  %s2877_s5 = inlined_call_operand.vmem [shape: f32[1,8], index: 5, kind: input, shape index: {}]   ;;  %s2878_s7 = inlined_call_operand.vmem [shape: f32[32,128], index: 7, kind: output, shape index: {}]  }
   0x1   :  { %v1990_v0 = vld [vmem:[%s2871_s1 + $0x44] ss:$0 sps:$4 sm:$0xff]   ;;  %v1991_v1 = vld [vmem:[%s2871_s1 + $0x20] ss:$0 sps:$4 sm:$0xff]   ;;  %v1993_v5 = vld [vmem:[%s2871_s1 + $0x18] sm:$0xff]   ;;  %s2040_s11 = smov 80  }
   0x2   :  { %1971 = vmatprep.subr.msk.bf16.mxu0 %vm92_vm0, %v1990_v0  ;;  %v94_v2 = vsel %vm92_vm0, %v1990_v0, 0  ;;  %v1992_v3 = vld [vmem:[%s2871_s1 + $0x3c] sm:$0xff]   ;;  %1972 = vmatprep.subr.msk.bf16.mxu1 %vm92_vm0, %v1991_v1  ;;  %v179_v4 = vsel %vm92_vm0, %v1991_v1, 0  ;;  %v1994_v6 = vld [vmem:[%s2871_s1 + $0x34] sm:$0xff]   ;;  %v1996_v8 = vld [vmem:[%s2871_s1 + $0x2c] sm:$0xff]   ;;  %s2041_s12 = smov 88  }
   0x3   :  { %1930 = vmatpush3.bf16.msra.mxu0 %v94_v2  ;;  %1944 = vmatpush3.bf16.msra.mxu1 %v179_v4  ;;  %v1995_v7 = vld [vmem:[%s2871_s1 + $0x10] sm:$0xff]   ;;  %v1997_v9 = vld [vmem:[%s2871_s1 + $0x8] sm:$0xff]   ;;  %v27_v13 = vld [vmem:[%s2872_s0] sm:$0xff]  ;;  %s2042_s13 = smov 64   ;;  %s2043_s14 = smov 72   ;;  %vm2891_vm4 = vcmask 195584  }
   0x4   :  { %1931 = vmatprep.subr.bf16.mxu0 %v1992_v3  ;;  %1945 = vmatprep.subr.bf16.mxu1 %v1993_v5  ;;  %v42_v10 = vld [vmem:[%s2872_s0 + $0x1] sm:$0xff]  ;;  %v43_v11 = vld [vmem:[%s2872_s0 + $0x9] sm:$0xff]  ;;  %v44_v18 = vld [vmem:[%s2872_s0 + $0x19] sm:$0xff]  ;;  %s2044_s15 = smov 48   ;;  %s2045_s16 = smov 56   ;;  %vm2890_vm5 = vcmask 261120  }
   0x5   :  { %v46_v12 = vpack.c.bf16 %v43_v11, %v42_v10  ;;  %v28_v14 = vld [vmem:[%s2872_s0 + $0x8] sm:$0xff]  ;;  %v1999_v17 = vld [vmem:[%s2871_s1] sm:$0xff]   ;;  %v29_v20 = vld [vmem:[%s2872_s0 + $0x18] sm:$0xff]  ;;  %s2046_s17 = smov 32   ;;  %s2047_s18 = smov 40   ;;  %vm2889_vm6 = vcmask 326656  }
   0x6   :  { %v1998_v15 = vld [vmem:[%s2871_s1 + $0x24] sm:$0xff]   ;;  %v31_v16 = vpack.c.bf16 %v28_v14, %v27_v13  ;;  %v2002_v30 = vld [vmem:[%s2871_s1 + $0x58] sm:$0xff]   ;;  %v2003_v31 = vld [vmem:[%s2871_s1 + $0x50] sm:$0xff]   ;;  %s2048_s19 = smov 16   ;;  %s2049_s20 = smov 24   ;;  %vm2888_vm7 = vcmask 392192  }
   0x7   :  { %1932 = vmatpush3.bf16.msra.mxu0 %v1992_v3  ;;  %1946 = vmatpush3.bf16.msra.mxu1 %v1993_v5  ;;  %v45_v19 = vld [vmem:[%s2872_s0 + $0x21] sm:$0xff]  ;;  %v231_v24 = vld [vmem:[%s2872_s0 + $0xa] sm:$0xff]  ;;  %s2050_s21 = smov 8   ;;  %vm2887_vm8 = vcmask 457728   ;;  %vm2886_vm9 = vcmask 523264   ;;  %vm2884_vm10 = vcmask 654336  }
   0x8   :  { %1933 = vmatprep.subr.bf16.mxu0 %v1994_v6  ;;  %1947 = vmatprep.subr.bf16.mxu1 %v1995_v7  ;;  %v30_v21 = vld [vmem:[%s2872_s0 + $0x20] sm:$0xff]  ;;  %v2000_v22 = vld [vmem:[%s2871_s1 + $0x68] ss:$0 sps:$4 sm:$0xff]   ;;  %v47_v25 = vpack.c.bf16 %v45_v19, %v44_v18  ;;  %vm2883_vm11 = vcmask 719872   ;;  %vm2882_vm12 = vcmask 785408   ;;  %vm2881_vm13 = vcmask 850944  }
   0x9   :  { %1939 = vmatprep.mubr.msk.bf16.mxu0 %vm2885_vm1, %v46_v12  ;;  %1953 = vmatprep.mubr.msk.bf16.mxu1 %vm2885_vm1, %v31_v16  ;;  %v230_v23 = vld [vmem:[%s2872_s0 + $0x2] sm:$0xff]  ;;  %v32_v26 = vpack.c.bf16 %v30_v21, %v29_v20  ;;  %v280_v27 = vsel %vm92_vm0, %v2000_v22, 0  ;;  %v232_v33 = vld [vmem:[%s2872_s0 + $0x1a] sm:$0xff]  ;;  %vm2880_vm14 = vcmask 916480   ;;  %vm2879_vm15 = vcmask 982016  }
   0xa   :  { %v2001_v28 = vld [vmem:[%s2871_s1 + $0x60] sm:$0xff]   ;;  %v234_v29 = vpack.c.bf16 %v231_v24, %v230_v23  ;;  %v2004_v32 = vld [vmem:[%s2871_s1 + $0x48] sm:$0xff]   ;;  %s2037_s1 = smov 120  }
   0xb   :  { %1934 = vmatpush3.bf16.msra.mxu0 %v1994_v6  ;;  %1948 = vmatpush3.bf16.msra.mxu1 %v1995_v7  ;;  %v233_v34 = vld [vmem:[%s2872_s0 + $0x22] sm:$0xff]  ;;  %s2036_s0 = smov 104  }
   0xc   :  { %1935 = vmatprep.subr.bf16.mxu0 %v1996_v8  ;;  %1949 = vmatprep.subr.bf16.mxu1 %v1997_v9  ;;  %v235_v35 = vpack.c.bf16 %v233_v34, %v232_v33 }
   0xf   :  { %1936 = vmatpush3.bf16.msra.mxu0 %v1996_v8  ;;  %1950 = vmatpush3.bf16.msra.mxu1 %v1997_v9 }
  0x10   :  { %1937 = vmatprep.subr.bf16.mxu0 %v1998_v15  ;;  %1951 = vmatprep.subr.bf16.mxu1 %v1999_v17 }
  0x13   :  { %1938 = vmatpush3.bf16.msra.mxu0 %v1998_v15  ;;  %1952 = vmatpush3.bf16.msra.mxu1 %v1999_v17 }
  0x14   :  { %1973 = vmatprep.subr.msk.bf16.mxu0 %vm92_vm0, %v2000_v22  ;;  %vm743_vm0 = vcmask 60416  }
  0x16   :  { %1940 = vmatmul.mubr.msk.bf16.vlgmr.msra.gmra.mxu0 %vm2885_vm1, %v47_v25  ;;  %1954 = vmatmul.mubr.msk.bf16.vlgmr.msra.gmra.mxu1 %vm2885_vm1, %v32_v26 }
  0x17   :  { %1958 = vmatpush3.bf16.msra.mxu0 %v280_v27  ;;  %1967 = vmatprep.mubr.msk.bf16.mxu0 %vm2885_vm1, %v234_v29 }
  0x18   :  { %1959 = vmatprep.subr.bf16.mxu0 %v2001_v28 }
  0x1b   :  { %1960 = vmatpush3.bf16.msra.mxu0 %v2001_v28 }
  0x1c   :  { %1961 = vmatprep.subr.bf16.mxu0 %v2002_v30 }
  0x1f   :  { %1962 = vmatpush3.bf16.msra.mxu0 %v2002_v30 }
  0x20   :  { %1963 = vmatprep.subr.bf16.mxu0 %v2003_v31 }
  0x23   :  { %1964 = vmatpush3.bf16.msra.mxu0 %v2003_v31 }
  0x24   :  { %1965 = vmatprep.subr.bf16.mxu0 %v2004_v32 }
  0x27   :  { %1966 = vmatpush3.bf16.msra.mxu0 %v2004_v32 }
  0x2a   :  { %1968 = vmatmul.mubr.msk.bf16.vlgmr.msra.gmra.mxu0 %vm2885_vm1, %v235_v35 }
  0xd6   :  { %v1941_v36 = vpop.f32.mrf.mxu0  ;;  %v1955_v37 = vpop.f32.mrf.mxu1 }
  0xd7   :  { %v224_v50 = vadd.f32 %v1955_v37, %v1941_v36 }
  0xd8   :  { %v130_v38 = vpop.f32.mrf.mxu0  ;;  %v215_v39 = vpop.f32.mrf.mxu1 }
  0xd9   :  { %v216_v47 = vadd.f32 %v215_v39, %v130_v38 }
  0xda   :  { %v1942_v40 = vpop.f32.mrf.mxu0  ;;  %v1956_v41 = vpop.f32.mrf.mxu1 }
  0xdb   :  { %v227_v53 = vadd.f32 %v1956_v41, %v1942_v40 }
  0xdc   :  { %v133_v42 = vpop.f32.mrf.mxu0  ;;  %v218_v44 = vpop.f32.mrf.mxu1 }
  0xdd   :  { %v219_v48 = vadd.f32 %v218_v44, %v133_v42 }
  0xea   :  { %v1969_v43 = vpop.f32.mrf.mxu0 }
  0xeb   :  { %v2189_v54 = vadd.f32 %v1969_v43, %v224_v50 }
  0xec   :  { %v316_v45 = vpop.f32.mrf.mxu0 }
  0xed   :  { %v2185_v51 = vadd.f32 %v316_v45, %v216_v47 }
  0xee   :  { %v1970_v46 = vpop.f32.mrf.mxu0 }
  0xef   :  { %v2193_v56 = vadd.f32 %v1970_v46, %v227_v53  ;;  %v483_v53 = vlaneseq }
  0xf0   :  { %v319_v49 = vpop.f32.mrf.mxu0 }
  0xf1   :  { %v2187_v52 = vadd.f32 %v319_v49, %v219_v48 }
  0xf3   :  { %v337_v55 = vadd.f32 %v2187_v52, %v2185_v51 }
  0xf5   :  { %v338_v57 = vadd.f32 %v337_v55, %v2189_v54 }
  0xf7   :  { %v339_v58 = vadd.f32 %v338_v57, %v2193_v56 }
  0xf9   :  { %v340_v59 = vrot.slane %v339_v58, 4 }
  0xfb   :  { %v341_v60 = vadd.f32 %v340_v59, %v339_v58 }
  0xfd   :  { %v342_v61 = vrot.slane %v341_v60, 2 }
  0xff   :  { %v343_v62 = vadd.f32 %v342_v61, %v341_v60  ;;  %v484_v60 = vshrl.u32 %v483_v53, 7 }
 0x101   :  { %v344_v63 = vrot.slane %v343_v62, 1 }
 0x103   :  { %v345_v0 = vadd.f32 %v344_v63, %v343_v62 }
 0x105   :  { %355 = vrot.lane.b32.xlu1 %v345_v0, %s2036_s0  ;;  %347 = vrot.lane.b32.xlu0 %v345_v0, %s2037_s1 }
 0x109   :  { %359 = vrot.lane.b32.xlu1 %v345_v0, %s2038_s9  ;;  %351 = vrot.lane.b32.xlu0 %v345_v0, %s2039_s10 }
 0x10d   :  { %367 = vrot.lane.b32.xlu1 %v345_v0, %s2040_s11  ;;  %363 = vrot.lane.b32.xlu0 %v345_v0, %s2041_s12 }
 0x111   :  { %375 = vrot.lane.b32.xlu1 %v345_v0, %s2042_s13  ;;  %371 = vrot.lane.b32.xlu0 %v345_v0, %s2043_s14 }
 0x115   :  { %383 = vrot.lane.b32.xlu1 %v345_v0, %s2044_s15  ;;  %379 = vrot.lane.b32.xlu0 %v345_v0, %s2045_s16 }
 0x119   :  { %391 = vrot.lane.b32.xlu1 %v345_v0, %s2046_s17  ;;  %387 = vrot.lane.b32.xlu0 %v345_v0, %s2047_s18 }
 0x11d   :  { %399 = vrot.lane.b32.xlu1 %v345_v0, %s2048_s19  ;;  %395 = vrot.lane.b32.xlu0 %v345_v0, %s2049_s20 }
 0x121   :  { %403 = vrot.lane.b32.xlu0 %v345_v0, %s2050_s21 }
 0x177   :  { %v356_v1 = vpop.permute.xlu1 %355  ;;  %v348_v2 = vpop.permute.xlu0 %347 }
 0x178   :  { %v350_v3 = vadd.f32 %v348_v2, %v345_v0 }
 0x17b   :  { %v360_v4 = vpop.permute.xlu1 %359  ;;  %v352_v5 = vpop.permute.xlu0 %351 }
 0x17c   :  { %v354_v6 = vadd.f32 %v352_v5, %v350_v3 }
 0x17e   :  { %v358_v7 = vadd.f32 %v356_v1, %v354_v6  ;;  %v2240_v1 = vsub.s32 0, %v484_v60 }
 0x17f   :  { %v368_v8 = vpop.permute.xlu1 %367  ;;  %v364_v9 = vpop.permute.xlu0 %363 }
 0x180   :  { %v362_v10 = vadd.f32 %v360_v4, %v358_v7 }
 0x182   :  { %v366_v11 = vadd.f32 %v364_v9, %v362_v10 }
 0x183   :  { %v376_v12 = vpop.permute.xlu1 %375  ;;  %v372_v13 = vpop.permute.xlu0 %371 }
 0x184   :  { %v370_v14 = vadd.f32 %v368_v8, %v366_v11 }
 0x186   :  { %v374_v15 = vadd.f32 %v372_v13, %v370_v14 }
 0x187   :  { %v384_v16 = vpop.permute.xlu1 %383  ;;  %v380_v17 = vpop.permute.xlu0 %379 }
 0x188   :  { %v378_v18 = vadd.f32 %v376_v12, %v374_v15 }
 0x18a   :  { %v382_v19 = vadd.f32 %v380_v17, %v378_v18 }
 0x18b   :  { %v388_v20 = vpop.permute.xlu0 %387  ;;  %v392_v22 = vpop.permute.xlu1 %391 }
 0x18c   :  { %v386_v21 = vadd.f32 %v384_v16, %v382_v19  ;;  %v2282_v19 = vld [vmem:[%s2873_s3] sm:$0x1] }
 0x18e   :  { %v390_v23 = vadd.f32 %v388_v20, %v386_v21  ;;  %v2286_v20 = vrot.slane %v2282_v19, %v2240_v1 }
 0x18f   :  { %v396_v24 = vpop.permute.xlu0 %395  ;;  %v400_v27 = vpop.permute.xlu1 %399 }
 0x190   :  { %v394_v25 = vadd.f32 %v392_v22, %v390_v23 }
 0x192   :  { %v398_v26 = vadd.f32 %v396_v24, %v394_v25 }
 0x193   :  { %v404_v29 = vpop.permute.xlu0 %403 }
 0x194   :  { %v402_v28 = vadd.f32 %v400_v27, %v398_v26 }
 0x196   :  { %v406_v30 = vadd.f32 %v404_v29, %v402_v28 }
 0x198   :  { %v407_v31 = vmul.f32 0.001953125, %v406_v30 }
 0x19a   :  { %412 = vrot.lane.b32.xlu0 %v407_v31, %s2048_s19  ;;  %409 = vrot.lane.b32.xlu1 %v407_v31, %s2050_s21 }
 0x19e   :  { %418 = vrot.lane.b32.xlu0 %v407_v31, %s2046_s17  ;;  %415 = vrot.lane.b32.xlu1 %v407_v31, %s2049_s20 }
 0x1a2   :  { %424 = vrot.lane.b32.xlu0 %v407_v31, %s2044_s15  ;;  %421 = vrot.lane.b32.xlu1 %v407_v31, %s2047_s18 }
 0x1a6   :  { %430 = vrot.lane.b32.xlu0 %v407_v31, %s2042_s13  ;;  %427 = vrot.lane.b32.xlu1 %v407_v31, %s2045_s16 }
 0x1aa   :  { %436 = vrot.lane.b32.xlu0 %v407_v31, %s2040_s11  ;;  %433 = vrot.lane.b32.xlu1 %v407_v31, %s2043_s14 }
 0x1ae   :  { %442 = vrot.lane.b32.xlu0 %v407_v31, %s2038_s9  ;;  %439 = vrot.lane.b32.xlu1 %v407_v31, %s2041_s12 }
 0x1b2   :  { %448 = vrot.lane.b32.xlu0 %v407_v31, %s2039_s10  ;;  %445 = vrot.lane.b32.xlu1 %v407_v31, %s2036_s0 }
 0x1b6   :  { %451 = vrot.lane.b32.xlu1 %v407_v31, %s2037_s1 }
 0x20c   :  { %v413_v32 = vpop.permute.xlu0 %412  ;;  %v410_v33 = vpop.permute.xlu1 %409 }
 0x20d   :  { %v455_v34 = vsel %vm2893_vm2, %v407_v31, %v410_v33 }
 0x20e   :  { %v457_v36 = vsel %vm2892_vm3, %v455_v34, %v413_v32 }
 0x210   :  { %v419_v35 = vpop.permute.xlu0 %418  ;;  %v416_v37 = vpop.permute.xlu1 %415 }
 0x211   :  { %v459_v38 = vsel %vm2891_vm4, %v457_v36, %v416_v37 }
 0x212   :  { %v461_v40 = vsel %vm2890_vm5, %v459_v38, %v419_v35 }
 0x214   :  { %v425_v39 = vpop.permute.xlu0 %424  ;;  %v422_v41 = vpop.permute.xlu1 %421 }
 0x215   :  { %v463_v42 = vsel %vm2889_vm6, %v461_v40, %v422_v41 }
 0x216   :  { %v465_v44 = vsel %vm2888_vm7, %v463_v42, %v425_v39  ;;  %vm734_vm7 = vsmask.f32 7954 }
 0x218   :  { %v431_v43 = vpop.permute.xlu0 %430  ;;  %v428_v45 = vpop.permute.xlu1 %427 }
 0x219   :  { %v467_v46 = vsel %vm2887_vm8, %v465_v44, %v428_v45 }
 0x21a   :  { %v469_v48 = vsel %vm2886_vm9, %v467_v46, %v431_v43  ;;  %vm732_vm9 = vsmask.f32 7938 }
 0x21c   :  { %v437_v47 = vpop.permute.xlu0 %436  ;;  %v434_v49 = vpop.permute.xlu1 %433 }
 0x21d   :  { %v470_v50 = vsel %vm2885_vm1, %v469_v48, %v434_v49 }
 0x21e   :  { %v472_v57 = vsel %vm2884_vm10, %v470_v50, %v437_v47  ;;  %vm750_vm10 = vcmask 57344  }
 0x220   :  { %v443_v55 = vpop.permute.xlu0 %442  ;;  %v440_v58 = vpop.permute.xlu1 %439 }
 0x221   :  { %v474_v59 = vsel %vm2883_vm11, %v472_v57, %v440_v58  ;;  %v335_v57 = vld [vmem:[%s2874_s2] sm:$0x1]  ;;  %vm722_vm11 = vcmask 126980  }
 0x222   :  { %v476_v61 = vsel %vm2882_vm12, %v474_v59, %v443_v55  ;;  %vm723_vm12 = vsmask.f32 4352 }
 0x223   :  { %vm724_vm8 = vmand %vm722_vm11, %vm723_vm12 }
 0x224   :  { %v446_v62 = vpop.permute.xlu1 %445  ;;  %v449_v63 = vpop.permute.xlu0 %448 }
 0x225   :  { %v478_v0 = vsel %vm2881_vm13, %v476_v61, %v446_v62  ;;  %v2051_v61 = vmov 0   ;;  %v2005_v62 = vld [vmem:[%s2875_s4 + $0x38] sm:$0xff]   ;;  %vm719_vm13 = vcmask 1040384  }
 0x226   :  { %v480_v2 = vsel %vm2880_vm14, %v478_v0, %v449_v63  ;;  %1182 = vmatprep.subr.bf16.mxu0 %v2051_v61  ;;  %1055 = vmatprep.subr.bf16.mxu1 %v2051_v61  ;;  %v2006_v63 = vld [vmem:[%s2875_s4 + $0x30] sm:$0xff]   ;;  %749 = vst.msk [vmem:[#allocation2 + $0x8] sm:$0xf] %vm743_vm0, %v2051_v61  ;;  %758 = vst.msk [vmem:[#allocation2 + $0x20] sm:$0xf] %vm743_vm0, %v2051_v61  ;;  %v2007_v0 = vld [vmem:[%s2875_s4 + $0x80] sm:$0xff]  }
 0x227   :  { %1183 = vmatpush1.bf16.msra.mxu0 %v2005_v62  ;;  %vm720_vm14 = vsmask.f32 256  ;;  %1056 = vmatpush1.bf16.msra.mxu1 %v2007_v0  ;;  %vm733_vm5 = vmand %vm719_vm13, %vm732_vm9 }
 0x228   :  { %v452_v3 = vpop.permute.xlu1 %451  ;;  %1184 = vmatprep.subr.bf16.mxu0 %v2051_v61  ;;  %1057 = vmatprep.subr.bf16.mxu1 %v2051_v61  ;;  %vm721_vm1 = vmand %vm719_vm13, %vm720_vm14  ;;  %vm862_vm13 = vcmask 64516  }
 0x229   :  { %v482_v4 = vsel %vm2879_vm15, %v480_v2, %v452_v3  ;;  %vm762_vm15 = vcmask 126016   ;;  %v2009_v2 = vld [vmem:[%s2875_s4 + $0x78] sm:$0xff]   ;;  %v2008_v3 = vld [vmem:[%s2875_s4 + $0x28] sm:$0xff]   ;;  %vm725_vm6 = vmor %vm724_vm8, %vm721_vm1  ;;  %vm860_vm8 = vcmask 1043520  }
 0x22a   :  { %v486_v5 = vrot.slane %v482_v4, %v2240_v1  ;;  %768 = vst.msk [vmem:[#allocation2 + $0xc] sm:$0xf] %vm762_vm15, %v2051_v61  ;;  %777 = vst.msk [vmem:[#allocation2 + $0x24] sm:$0xf] %vm762_vm15, %v2051_v61  ;;  %v2011_v4 = vld [vmem:[%s2875_s4 + $0x70] sm:$0xff]  }
 0x22b   :  { %1185 = vmatpush1.bf16.msra.mxu0 %v2006_v63  ;;  %1058 = vmatpush1.bf16.msra.mxu1 %v2009_v2  ;;  %vm2385_vm4 = vmand %vm750_vm10, %vm720_vm14 }
 0x22c   :  { %v2246_v6 = vsub.f32 %v2185_v51, %v486_v5  ;;  %v2249_v7 = vsub.f32 %v2187_v52, %v486_v5  ;;  %v2252_v8 = vsub.f32 %v2189_v54, %v486_v5  ;;  %v2255_v9 = vsub.f32 %v2193_v56, %v486_v5  ;;  %1186 = vmatprep.subr.bf16.mxu0 %v2051_v61  ;;  %v2010_v5 = vld [vmem:[%s2875_s4 + $0x20] sm:$0xff]   ;;  %vm735_vm1 = vmand %vm722_vm11, %vm734_vm7 }
 0x22d   :  { %1059 = vmatprep.subr.bf16.mxu1 %v2051_v61  ;;  %vm2397_vm10 = vmand %vm743_vm0, %vm732_vm9  ;;  %vm769_vm0 = vcmask 122944  }
 0x22e   :  { %v491_v10 = vmul.f32 %v2246_v6, %v2246_v6  ;;  %v492_v11 = vmul.f32 %v2249_v7, %v2249_v7  ;;  %v493_v12 = vmul.f32 %v2252_v8, %v2252_v8  ;;  %v494_v52 = vmul.f32 %v2255_v9, %v2255_v9  ;;  %vm2404_vm11 = vmand %vm762_vm15, %vm732_vm9 }
 0x22f   :  { %1187 = vmatpush1.bf16.msra.mxu0 %v2008_v3  ;;  %1060 = vmatpush1.bf16.msra.mxu1 %v2011_v4 }
 0x230   :  { %v495_v51 = vadd.f32 %v492_v11, %v491_v10  ;;  %v726_v10 = vld [vmem:[#allocation2] sm:$0x11]  ;;  %v729_v11 = vld [vmem:[#allocation2 + $0x18] sm:$0x11]  ;;  %1188 = vmatprep.subr.bf16.mxu0 %v2051_v61  ;;  %1061 = vmatprep.subr.bf16.mxu1 %v2051_v61 }
 0x232   :  { %v496_v13 = vadd.f32 %v495_v51, %v493_v12  ;;  %v737_v12 = vld [vmem:[#allocation2 + $0x10] sm:$0x11]  ;;  %v740_v51 = vld [vmem:[#allocation2 + $0x28] sm:$0x11] }
 0x233   :  { %1189 = vmatpush1.bf16.msra.mxu0 %v2010_v5 }
 0x234   :  { %v497_v14 = vadd.f32 %v496_v13, %v494_v52  ;;  %v727_v52 = vsel %vm725_vm6, 0, %v726_v10  ;;  %v730_v13 = vsel %vm725_vm6, 0, %v729_v11  ;;  %vm736_vm6 = vmor %vm735_vm1, %vm733_vm5  ;;  %1190 = vmatprep.subr.bf16.mxu0 %v2051_v61 }
 0x235   :  { %728 = vst [vmem:[#allocation2] sm:$0x11] %v727_v52  ;;  %731 = vst [vmem:[#allocation2 + $0x18] sm:$0x11] %v730_v13 }
 0x236   :  { %v498_v54 = vrot.slane %v497_v14, 4  ;;  %vm2410_vm5 = vmand %vm860_vm8, %vm732_vm9 }
 0x237   :  { %vm2416_vm1 = vmand %vm862_vm13, %vm734_vm7  ;;  %vm2907_vm7 = vcmask 261120  }
 0x238   :  { %v499_v15 = vadd.f32 %v498_v54, %v497_v14  ;;  %v2012_v54 = vld [vmem:[%s2875_s4 + $0x18] sm:$0xff]   ;;  %vm2426_vm9 = vmand %vm769_vm0, %vm720_vm14  ;;  %vm2911_vm0 = vcmask 523264  }
 0x239   :  { %1191 = vmatpush1.bf16.msra.mxu0 %v2012_v54 }
 0x23a   :  { %v500_v16 = vrot.slane %v499_v15, 2  ;;  %1192 = vmatprep.subr.bf16.mxu0 %v2051_v61 }
 0x23c   :  { %v501_v56 = vadd.f32 %v500_v16, %v499_v15  ;;  %v738_v15 = vsel %vm736_vm6, 0, %v737_v12  ;;  %v741_v16 = vsel %vm736_vm6, 0, %v740_v51  ;;  %vm2908_vm6 = vcmask 326656  }
 0x23d   :  { %739 = vst [vmem:[#allocation2 + $0x10] sm:$0x11] %v738_v15  ;;  %742 = vst [vmem:[#allocation2 + $0x28] sm:$0x11] %v741_v16 }
 0x23e   :  { %v502_v17 = vrot.slane %v501_v56, 1 }
 0x240   :  { %v503_v18 = vadd.f32 %v502_v17, %v501_v56 }
 0x242   :  { %509 = vrot.lane.b32.xlu1 %v503_v18, %s2039_s10  ;;  %505 = vrot.lane.b32.xlu0 %v503_v18, %s2037_s1 }
 0x246   :  { %517 = vrot.lane.b32.xlu1 %v503_v18, %s2038_s9  ;;  %513 = vrot.lane.b32.xlu0 %v503_v18, %s2036_s0 }
 0x24a   :  { %525 = vrot.lane.b32.xlu1 %v503_v18, %s2040_s11  ;;  %521 = vrot.lane.b32.xlu0 %v503_v18, %s2041_s12 }
 0x24e   :  { %533 = vrot.lane.b32.xlu1 %v503_v18, %s2042_s13  ;;  %529 = vrot.lane.b32.xlu0 %v503_v18, %s2043_s14 }
 0x252   :  { %541 = vrot.lane.b32.xlu1 %v503_v18, %s2044_s15  ;;  %537 = vrot.lane.b32.xlu0 %v503_v18, %s2045_s16 }
 0x256   :  { %549 = vrot.lane.b32.xlu1 %v503_v18, %s2046_s17  ;;  %545 = vrot.lane.b32.xlu0 %v503_v18, %s2047_s18 }
 0x25a   :  { %557 = vrot.lane.b32.xlu1 %v503_v18, %s2048_s19  ;;  %553 = vrot.lane.b32.xlu0 %v503_v18, %s2049_s20 }
 0x25e   :  { %561 = vrot.lane.b32.xlu0 %v503_v18, %s2050_s21 }
 0x262   :  { %647 = vrot.lane.b32.xlu0 %v2286_v20, %s2050_s21 }
 0x266   :  { %650 = vrot.lane.b32.xlu0 %v2286_v20, %s2048_s19 }
 0x26a   :  { %653 = vrot.lane.b32.xlu0 %v2286_v20, %s2049_s20 }
 0x26e   :  { %656 = vrot.lane.b32.xlu0 %v2286_v20, %s2046_s17 }
 0x272   :  { %659 = vrot.lane.b32.xlu0 %v2286_v20, %s2047_s18 }
 0x276   :  { %662 = vrot.lane.b32.xlu0 %v2286_v20, %s2044_s15 }
 0x27a   :  { %665 = vrot.lane.b32.xlu0 %v2286_v20, %s2045_s16 }
 0x27e   :  { %668 = vrot.lane.b32.xlu0 %v2286_v20, %s2042_s13 }
 0x282   :  { %671 = vrot.lane.b32.xlu0 %v2286_v20, %s2043_s14 }
 0x286   :  { %674 = vrot.lane.b32.xlu0 %v2286_v20, %s2040_s11 }
 0x2b4   :  { %v510_v21 = vpop.permute.xlu1 %509  ;;  %v506_v22 = vpop.permute.xlu0 %505 }
 0x2b5   :  { %v508_v23 = vadd.f32 %v506_v22, %v503_v18  ;;  %v745_v22 = vld [vmem:[#allocation2] sm:$0xf] }
 0x2b7   :  { %v512_v24 = vadd.f32 %v510_v21, %v508_v23  ;;  %v755_v23 = vld [vmem:[#allocation2 + $0x18] sm:$0xf] }
 0x2b8   :  { %v518_v25 = vpop.permute.xlu1 %517  ;;  %v514_v26 = vpop.permute.xlu0 %513 }
 0x2b9   :  { %v516_v27 = vadd.f32 %v514_v26, %v512_v24  ;;  %v764_v24 = vld [vmem:[#allocation2 + $0x4] sm:$0xf]  ;;  %v746_v26 = vsel %vm2397_vm10, 0, %v745_v22 }
 0x2ba   :  { %747 = vst [vmem:[#allocation2] sm:$0xf] %v746_v26 }
 0x2bb   :  { %v520_v28 = vadd.f32 %v518_v25, %v516_v27  ;;  %v756_v27 = vsel %vm2397_vm10, 0, %v755_v23  ;;  %vm2909_vm10 = vcmask 392192  }
 0x2bc   :  { %v526_v29 = vpop.permute.xlu1 %525  ;;  %v522_v30 = vpop.permute.xlu0 %521  ;;  %757 = vst [vmem:[#allocation2 + $0x18] sm:$0xf] %v756_v27 }
 0x2bd   :  { %v524_v31 = vadd.f32 %v522_v30, %v520_v28  ;;  %v765_v28 = vsel %vm2404_vm11, 0, %v764_v24 }
 0x2be   :  { %766 = vst [vmem:[#allocation2 + $0x4] sm:$0xf] %v765_v28 }
 0x2bf   :  { %v528_v32 = vadd.f32 %v526_v29, %v524_v31  ;;  %v774_v29 = vld [vmem:[#allocation2 + $0x1c] sm:$0xf]  ;;  %v752_v31 = vld [vmem:[#allocation2 + $0x10] sm:$0x1] }
 0x2c0   :  { %v534_v33 = vpop.permute.xlu1 %533  ;;  %v530_v34 = vpop.permute.xlu0 %529  ;;  %v775_v30 = vsel %vm2404_vm11, 0, %v774_v29  ;;  %vm2910_vm11 = vcmask 457728  }
 0x2c1   :  { %v532_v35 = vadd.f32 %v530_v34, %v528_v32  ;;  %v759_v32 = vld [vmem:[#allocation2 + $0x28] sm:$0x1]  ;;  %776 = vst [vmem:[#allocation2 + $0x1c] sm:$0xf] %v775_v30  ;;  %v753_v34 = vsel %vm2385_vm4, 0, %v752_v31  ;;  %vm2916_vm15 = vmmov %vm2910_vm11 }
 0x2c2   :  { %754 = vst [vmem:[#allocation2 + $0x10] sm:$0x1] %v753_v34 }
 0x2c3   :  { %v536_v36 = vadd.f32 %v534_v33, %v532_v35  ;;  %v771_v33 = vld [vmem:[#allocation2 + $0x14] sm:$0x1]  ;;  %v760_v35 = vsel %vm2385_vm4, 0, %v759_v32  ;;  %vm2906_vm4 = vcmask 195584  }
 0x2c4   :  { %v542_v37 = vpop.permute.xlu1 %541  ;;  %v538_v38 = vpop.permute.xlu0 %537  ;;  %761 = vst [vmem:[#allocation2 + $0x28] sm:$0x1] %v760_v35 }
 0x2c5   :  { %v540_v39 = vadd.f32 %v538_v38, %v536_v36  ;;  %v772_v36 = vsel %vm2426_vm9, 0, %v771_v33 }
 0x2c6   :  { %773 = vst [vmem:[#allocation2 + $0x14] sm:$0x1] %v772_v36 }
 0x2c7   :  { %v544_v40 = vadd.f32 %v542_v37, %v540_v39  ;;  %v778_v37 = vld [vmem:[#allocation2 + $0x2c] sm:$0x1] }
 0x2c8   :  { %v550_v41 = vpop.permute.xlu1 %549  ;;  %v546_v42 = vpop.permute.xlu0 %545  ;;  %v779_v39 = vsel %vm2426_vm9, 0, %v778_v37  ;;  %vm2912_vm9 = vmmov %vm2906_vm4 }
 0x2c9   :  { %v548_v43 = vadd.f32 %v546_v42, %v544_v40  ;;  %780 = vst [vmem:[#allocation2 + $0x2c] sm:$0x1] %v779_v39 }
 0x2cb   :  { %v552_v44 = vadd.f32 %v550_v41, %v548_v43 }
 0x2cc   :  { %v554_v45 = vpop.permute.xlu0 %553  ;;  %v558_v47 = vpop.permute.xlu1 %557 }
 0x2cd   :  { %v556_v46 = vadd.f32 %v554_v45, %v552_v44 }
 0x2cf   :  { %v560_v48 = vadd.f32 %v558_v47, %v556_v46 }
 0x2d0   :  { %v562_v49 = vpop.permute.xlu0 %561 }
 0x2d1   :  { %v564_v50 = vadd.f32 %v562_v49, %v560_v48 }
 0x2d3   :  { %v565_v53 = vmul.f32 0.001953125, %v564_v50 }
 0x2d4   :  { %v648_v21 = vpop.permute.xlu0 %647 }
 0x2d5   :  { %v566_v55 = vadd.f32 1e-05, %v565_v53  ;;  %v692_v53 = vsel %vm2893_vm2, %v2282_v19, %v648_v21 }
 0x2d7   :  { %2032 = vrsqrt.f32 %v566_v55 }
 0x2d8   :  { %v651_v38 = vpop.permute.xlu0 %650 }
 0x2dc   :  { %v654_v40 = vpop.permute.xlu0 %653 }
 0x2e0   :  { %v657_v41 = vpop.permute.xlu0 %656 }
 0x2e4   :  { %v2033_v58 = vpop.eup %2032  ;;  %v660_v42 = vpop.permute.xlu0 %659 }
 0x2e5   :  { %v2312_v59 = vmul.f32 %v2033_v58, %v335_v57  ;;  %v693_v58 = vsel %vm2892_vm3, %v692_v53, %v651_v38 }
 0x2e6   :  { %v694_v62 = vsel %vm2906_vm4, %v693_v58, %v654_v40  ;;  %vm2913_vm4 = vmmov %vm2907_vm7  ;;  %v2015_v58 = vld [vmem:[%s2875_s4 + $0x60] sm:$0xff]  }
 0x2e7   :  { %v573_v60 = vrot.slane %v2312_v59, %v2240_v1  ;;  %v695_v2 = vsel %vm2907_vm7, %v694_v62, %v657_v41  ;;  %vm2914_vm7 = vmmov %vm2908_vm6 }
 0x2e8   :  { %v663_v44 = vpop.permute.xlu0 %662  ;;  %v696_v3 = vsel %vm2908_vm6, %v695_v2, %v660_v42  ;;  %vm2915_vm6 = vcmask 588800  }
 0x2e9   :  { %577 = vrot.lane.b32.xlu0 %v573_v60, %s2048_s19  ;;  %574 = vrot.lane.b32.xlu1 %v573_v60, %s2050_s21  ;;  %v697_v10 = vsel %vm2909_vm10, %v696_v3, %v663_v44 }
 0x2ec   :  { %v666_v47 = vpop.permute.xlu0 %665 }
 0x2ed   :  { %580 = vrot.lane.b32.xlu1 %v573_v60, %s2049_s20  ;;  %677 = vrot.lane.b32.xlu0 %v2286_v20, %s2041_s12  ;;  %v698_v12 = vsel %vm2910_vm11, %v697_v10, %v666_v47  ;;  %vm2917_vm11 = vmmov %vm2911_vm0  ;;  %v2018_v10 = vld [vmem:[%s2875_s4] sm:$0xff]  }
 0x2f0   :  { %v669_v49 = vpop.permute.xlu0 %668 }
 0x2f1   :  { %583 = vrot.lane.b32.xlu1 %v573_v60, %s2046_s17  ;;  %680 = vrot.lane.b32.xlu0 %v2286_v20, %s2038_s9  ;;  %v699_v14 = vsel %vm2911_vm0, %v698_v12, %v669_v49  ;;  %v2014_v49 = vld [vmem:[%s2875_s4 + $0x10] sm:$0xff]  }
 0x2f2   :  { %1193 = vmatpush1.bf16.msra.mxu0 %v2014_v49 }
 0x2f3   :  { %1194 = vmatprep.subr.bf16.mxu0 %v2051_v61 }
 0x2f4   :  { %v672_v57 = vpop.permute.xlu0 %671 }
 0x2f5   :  { %586 = vrot.lane.b32.xlu1 %v573_v60, %s2047_s18  ;;  %683 = vrot.lane.b32.xlu0 %v2286_v20, %s2036_s0  ;;  %v700_v56 = vsel %vm2915_vm6, %v699_v14, %v672_v57 }
 0x2f8   :  { %v675_v63 = vpop.permute.xlu0 %674 }
 0x2f9   :  { %589 = vrot.lane.b32.xlu1 %v573_v60, %s2044_s15  ;;  %689 = vrot.lane.b32.xlu0 %v2286_v20, %s2037_s1 }
 0x2fd   :  { %592 = vrot.lane.b32.xlu1 %v573_v60, %s2045_s16 }
 0x301   :  { %595 = vrot.lane.b32.xlu1 %v573_v60, %s2042_s13 }
 0x305   :  { %598 = vrot.lane.b32.xlu1 %v573_v60, %s2043_s14 }
 0x309   :  { %601 = vrot.lane.b32.xlu1 %v573_v60, %s2040_s11 }
 0x30d   :  { %604 = vrot.lane.b32.xlu1 %v573_v60, %s2041_s12 }
 0x311   :  { %607 = vrot.lane.b32.xlu1 %v573_v60, %s2038_s9 }
 0x315   :  { %610 = vrot.lane.b32.xlu1 %v573_v60, %s2036_s0 }
 0x319   :  { %613 = vrot.lane.b32.xlu1 %v573_v60, %s2039_s10 }
 0x31d   :  { %616 = vrot.lane.b32.xlu1 %v573_v60, %s2037_s1 }
 0x321   :  { %686 = vrot.lane.b32.xlu1 %v2286_v20, %s2039_s10 }
 0x35b   :  { %v575_v43 = vpop.permute.xlu1 %574  ;;  %v578_v5 = vpop.permute.xlu0 %577 }
 0x35c   :  { %v619_v19 = vsel %vm2893_vm2, %v2312_v59, %v575_v43  ;;  %vm2919_vm2 = vmmov %vm2915_vm6  ;;  %vm2924_vm6 = vcmask 850944  }
 0x35d   :  { %v620_v52 = vsel %vm2892_vm3, %v619_v19, %v578_v5  ;;  %vm2918_vm3 = vcmask 654336   ;;  %v2017_v5 = vld [vmem:[%s2875_s4 + $0x58] sm:$0xff]  }
 0x35e   :  { %v701_v24 = vsel %vm2918_vm3, %v700_v56, %v675_v63  ;;  %vm2920_vm0 = vmmov %vm2918_vm3  ;;  %vm2927_vm3 = vcmask 982016   ;;  %v2019_v56 = vld [vmem:[%s2875_s4 + $0x50] sm:$0xff]  }
 0x35f   :  { %v581_v45 = vpop.permute.xlu1 %580  ;;  %v678_v51 = vpop.permute.xlu0 %677 }
 0x360   :  { %v621_v54 = vsel %vm2912_vm9, %v620_v52, %v581_v45  ;;  %vm2921_vm9 = vcmask 719872  }
 0x363   :  { %v584_v46 = vpop.permute.xlu1 %583  ;;  %v681_v59 = vpop.permute.xlu0 %680 }
 0x364   :  { %v622_v15 = vsel %vm2913_vm4, %v621_v54, %v584_v46  ;;  %vm2922_vm4 = vmmov %vm2921_vm9 }
 0x365   :  { %v702_v29 = vsel %vm2922_vm4, %v701_v24, %v678_v51 }
 0x367   :  { %v587_v48 = vpop.permute.xlu1 %586  ;;  %v684_v31 = vpop.permute.xlu0 %683 }
 0x368   :  { %v623_v16 = vsel %vm2914_vm7, %v622_v15, %v587_v48  ;;  %vm2923_vm7 = vcmask 785408   ;;  %v2013_v48 = vld [vmem:[%s2875_s4 + $0x68] sm:$0xff]  }
 0x369   :  { %1062 = vmatpush1.bf16.msra.mxu1 %v2013_v48  ;;  %v880_v48 = vld [vmem:[#allocation2 + $0x18] sm:$0xff] }
 0x36a   :  { %1063 = vmatprep.subr.bf16.mxu1 %v2051_v61 }
 0x36b   :  { %v590_v50 = vpop.permute.xlu1 %589  ;;  %v690_v38 = vpop.permute.xlu0 %689 }
 0x36c   :  { %v624_v17 = vsel %vm2909_vm10, %v623_v16, %v590_v50  ;;  %vm2925_vm10 = vcmask 916480  }
 0x36d   :  { %1064 = vmatpush1.bf16.msra.mxu1 %v2015_v58 }
 0x36e   :  { %1065 = vmatprep.subr.bf16.mxu1 %v2051_v61 }
 0x36f   :  { %v593_v55 = vpop.permute.xlu1 %592 }
 0x370   :  { %v625_v22 = vsel %vm2916_vm15, %v624_v17, %v593_v55  ;;  %vm2926_vm15 = vmmov %vm2923_vm7  ;;  %v2020_v17 = vld [vmem:[%s2875_s4 + $0x40] sm:$0xff]  }
 0x371   :  { %v703_v35 = vsel %vm2926_vm15, %v702_v29, %v681_v59  ;;  %1066 = vmatpush1.bf16.msra.mxu1 %v2017_v5 }
 0x372   :  { %1067 = vmatprep.subr.bf16.mxu1 %v2051_v61 }
 0x373   :  { %v596_v60 = vpop.permute.xlu1 %595 }
 0x374   :  { %v626_v23 = vsel %vm2917_vm11, %v625_v22, %v596_v60  ;;  %vm2929_vm11 = vmmov %vm2925_vm10  ;;  %v2016_v60 = vld [vmem:[%s2875_s4 + $0x8] sm:$0xff]  }
 0x375   :  { %1195 = vmatpush1.bf16.msra.mxu0 %v2016_v60  ;;  %1068 = vmatpush1.bf16.msra.mxu1 %v2019_v56  ;;  %v884_v60 = vld [vmem:[#allocation2 + $0x28] sm:$0x11] }
 0x376   :  { %1196 = vmatprep.subr.bf16.mxu0 %v2051_v61  ;;  %1069 = vmatprep.subr.bf16.mxu1 %v2051_v61 }
 0x377   :  { %v599_v0 = vpop.permute.xlu1 %598 }
 0x378   :  { %v627_v25 = vsel %vm2919_vm2, %v626_v23, %v599_v0  ;;  %vm2928_vm2 = vmmov %vm2924_vm6 }
 0x379   :  { %v704_v39 = vsel %vm2928_vm2, %v703_v35, %v684_v31  ;;  %1197 = vmatpush1.bf16.msra.mxu0 %v2018_v10  ;;  %v865_v35 = vld [vmem:[#allocation2] sm:$0xff]  ;;  %vm2939_vm2 = vcmask 64512  }
 0x37a   :  { %1212 = vmatprep.subr.bf16.mxu0 %v2051_v61 }
 0x37b   :  { %v602_v4 = vpop.permute.xlu1 %601 }
 0x37c   :  { %v628_v26 = vsel %vm2920_vm0, %v627_v25, %v602_v4  ;;  %vm2930_vm0 = vmmov %vm2927_vm3 }
 0x37d   :  { %1213 = vmatpush2.bf16.msra.mxu0 %v2020_v17 }
 0x37f   :  { %v605_v11 = vpop.permute.xlu1 %604 }
 0x380   :  { %v629_v28 = vsel %vm2921_vm9, %v628_v26, %v605_v11  ;;  %vm793_vm9 = vsmask.f32 4368  ;;  %v2021_v26 = vld [vmem:[%s2875_s4 + $0x48] sm:$0xff]  }
 0x381   :  { %vm2507_vm4 = vmor %vm720_vm14, %vm793_vm9  ;;  %1070 = vmatpush1.bf16.msra.mxu1 %v2021_v26 }
 0x382   :  { %1085 = vmatprep.subr.bf16.mxu1 %v2051_v61  ;;  %vm2945_vm9 = vmmov %vm2939_vm2 }
 0x383   :  { %v608_v13 = vpop.permute.xlu1 %607 }
 0x384   :  { %v630_v30 = vsel %vm2923_vm7, %v629_v28, %v608_v13  ;;  %vm872_vm7 = vcmask 1040448  }
 0x385   :  { %vm2545_vm15 = vmand %vm872_vm7, %vm720_vm14  ;;  %vm912_vm7 = vsmask.f32 7440 }
 0x386   :  { %vm2942_vm14 = vmmov %vm2939_vm2 }
 0x387   :  { %v611_v21 = vpop.permute.xlu1 %610 }
 0x388   :  { %v631_v32 = vsel %vm2924_vm6, %v630_v30, %v611_v21  ;;  %v2022_v30 = vld [vmem:[%s2875_s4 + $0x88] sm:$0xff]   ;;  %vm874_vm6 = vcmask 61444  }
 0x389   :  { %1086 = vmatpush2.bf16.msra.mxu1 %v2022_v30 }
 0x38a   :  { %1347 = vmatprep.subr.bf16.mxu1 %v2051_v61 }
 0x38b   :  { %v614_v27 = vpop.permute.xlu1 %613 }
 0x38c   :  { %v632_v33 = vsel %vm2925_vm10, %v631_v32, %v614_v27  ;;  %vm2540_vm10 = vmor %vm862_vm13, %vm860_vm8 }
 0x38d   :  { %vm2940_vm8 = vmor %vm2416_vm1, %vm2410_vm5  ;;  %vm2947_vm5 = vcmask 130048   ;;  %vm911_vm1 = vsmask.f32 3328 }
 0x38e   :  { %vm2941_vm13 = vmmov %vm2939_vm2 }
 0x38f   :  { %v617_v34 = vpop.permute.xlu1 %616 }
 0x390   :  { %v633_v36 = vsel %vm2927_vm3, %v632_v33, %v617_v34  ;;  %vm2550_vm3 = vmand %vm874_vm6, %vm723_vm12 }
 0x391   :  { %v637_v37 = vrot.slane %v633_v36, %v2240_v1  ;;  %vm876_vm12 = vmor %vm2550_vm3, %vm2545_vm15  ;;  %vm1237_vm3 = vcmask 1042432  }
 0x392   :  { %vm2597_vm6 = vmor %vm911_vm1, %vm912_vm7  ;;  %vm2962_vm1 = vcmask 392192   ;;  %vm2963_vm7 = vcmask 457728  }
 0x393   :  { %v687_v40 = vpop.permute.xlu1 %686  ;;  %v638_v42 = vmul.f32 %v637_v37, %v2246_v6  ;;  %v639_v44 = vmul.f32 %v637_v37, %v2249_v7  ;;  %v640_v45 = vmul.f32 %v637_v37, %v2252_v8  ;;  %v641_v46 = vmul.f32 %v637_v37, %v2255_v9  ;;  %vm2951_vm15 = vmmov %vm2947_vm5 }
 0x394   :  { %v705_v41 = vsel %vm2929_vm11, %v704_v39, %v687_v40  ;;  %vm2943_vm11 = vmmov %vm2939_vm2 }
 0x395   :  { %v706_v43 = vsel %vm2930_vm0, %v705_v41, %v690_v38  ;;  %vm2944_vm0 = vmmov %vm2940_vm8 }
 0x396   :  { %v710_v47 = vrot.slane %v706_v43, %v2240_v1 }
 0x398   :  { %v712_v50 = vadd.f32 %v710_v47, %v639_v44  ;;  %v714_v6 = vadd.f32 %v710_v47, %v641_v46  ;;  %v711_v53 = vadd.f32 %v710_v47, %v638_v42  ;;  %v713_v55 = vadd.f32 %v710_v47, %v640_v45  ;;  %v877_v45 = vld [vmem:[#allocation2 + $0x10] sm:$0x11] }
 0x39a   :  { %v715_v7 = vmax.f32 %v711_v53, 0.0  ;;  %v716_v8 = vmax.f32 %v712_v50, 0.0  ;;  %v717_v9 = vmax.f32 %v713_v55, 0.0  ;;  %v718_v57 = vmax.f32 %v714_v6, 0.0 }
 0x39c   :  { %v1904_v62 = vpack.c.bf16 %v715_v7, %v715_v7  ;;  %v1905_v63 = vpack.c.bf16 %v716_v8, %v716_v8  ;;  %v1906_v0 = vpack.c.bf16 %v717_v9, %v717_v9  ;;  %v1907_v2 = vpack.c.bf16 %v718_v57, %v718_v57 }
 0x39e   :  { %v796_v3 = vshrl.u32 %v1904_v62, 16  ;;  %v804_v4 = vshrl.u32 %v1905_v63, 16  ;;  %v813_v11 = vshrl.u32 %v1906_v0, 16  ;;  %v821_v19 = vshrl.u32 %v1907_v2, 16 }
 0x39f   :  { %v799_v51 = vshll.u32 %v1904_v62, 16  ;;  %v807_v13 = vshll.u32 %v1905_v63, 16  ;;  %v816_v23 = vshll.u32 %v1906_v0, 16  ;;  %v824_v24 = vshll.u32 %v1907_v2, 16 }
 0x3a0   :  { %v798_v12 = vrot.slane %v796_v3, 7  ;;  %v806_v52 = vrot.slane %v804_v4, 7  ;;  %v815_v21 = vrot.slane %v813_v11, 7  ;;  %v823_v59 = vrot.slane %v821_v19, 7 }
 0x3a2   :  { %v801_v54 = vor.u32 %v799_v51, %v798_v12  ;;  %v802_v15 = vrot.slane %v798_v12, 4  ;;  %v809_v16 = vor.u32 %v807_v13, %v806_v52  ;;  %v811_v25 = vrot.slane %v806_v52, 4 }
 0x3a3   :  { %v818_v27 = vor.u32 %v816_v23, %v815_v21  ;;  %v819_v28 = vrot.slane %v815_v21, 4  ;;  %v826_v29 = vor.u32 %v824_v24, %v823_v59  ;;  %v828_v32 = vrot.slane %v823_v59, 4 }
 0x3a4   :  { %829 = vrot.lane.b32.xlu1 %v801_v54, %s2050_s21  ;;  %v810_v22 = vsel %vm2507_vm4, %v802_v15, %v809_v16 }
 0x3a5   :  { %831 = vrot.lane.b32.xlu0 %v810_v22, %s2050_s21  ;;  %v827_v31 = vsel %vm2507_vm4, %v819_v28, %v826_v29  ;;  %vm2946_vm4 = vmmov %vm2939_vm2 }
 0x3a8   :  { %833 = vrot.lane.b32.xlu1 %v811_v25, %s2050_s21 }
 0x3a9   :  { %835 = vrot.lane.b32.xlu0 %v818_v27, %s2050_s21 }
 0x3ac   :  { %837 = vrot.lane.b32.xlu1 %v827_v31, %s2050_s21 }
 0x3ad   :  { %839 = vrot.lane.b32.xlu0 %v828_v32, %s2050_s21 }
 0x416   :  { %v830_v34 = vpop.permute.xlu1 %829 }
 0x417   :  { %v841_v36 = vrot.slane %v830_v34, 4  ;;  %v832_v37 = vpop.permute.xlu0 %831 }
 0x418   :  { %v842_v39 = vrot.slane %v832_v37, 4 }
 0x419   :  { %v848_v41 = vsel %vm2939_vm2, %v841_v36, %v830_v34  ;;  %vm1238_vm2 = vcmask 1046532  }
 0x41a   :  { %v866_v42 = vsel %vm2940_vm8, %v848_v41, %v865_v35  ;;  %v849_v43 = vsel %vm2941_vm13, %v842_v39, %v832_v37  ;;  %v834_v44 = vpop.permute.xlu1 %833  ;;  %v2023_v35 = vld [vmem:[%s2875_s4 + $0xc8] sm:$0xff]   ;;  %vm2626_vm8 = vmor %vm1237_vm3, %vm1238_vm2  ;;  %vm2967_vm3 = vcmask 719872   ;;  %vm2968_vm2 = vcmask 785408  }
 0x41b   :  { %867 = vst [vmem:[#allocation2] sm:$0xff] %v866_v42  ;;  %871 = vst.msk [vmem:[#allocation2 + $0x8] sm:$0xff] %vm2540_vm10, %v849_v43  ;;  %v843_v46 = vrot.slane %v834_v44, 4  ;;  %v836_v47 = vpop.permute.xlu0 %835  ;;  %v915_v6 = vshrl.u32 %v866_v42, 16  ;;  %v918_v8 = vshll.u32 %v866_v42, 16 }
 0x41c   :  { %v844_v49 = vrot.slane %v836_v47, 4  ;;  %vm2954_vm13 = vmmov %vm2947_vm5 }
 0x41d   :  { %v850_v50 = vsel %vm2942_vm14, %v843_v46, %v834_v44  ;;  %v917_v0 = vrot.slane %v915_v6, 4  ;;  %v920_v18 = vrot.slane %v918_v8, 5  ;;  %vm2956_vm14 = vmmov %vm2947_vm5 }
 0x41e   :  { %v878_v53 = vsel %vm876_vm12, %v850_v50, %v877_v45  ;;  %v851_v55 = vsel %vm2943_vm11, %v844_v49, %v836_v47  ;;  %v838_v7 = vpop.permute.xlu1 %837  ;;  %vm2957_vm11 = vmmov %vm2946_vm4 }
 0x41f   :  { %879 = vst [vmem:[#allocation2 + $0x10] sm:$0x11] %v878_v53  ;;  %v881_v9 = vsel %vm2944_vm0, %v851_v55, %v880_v48  ;;  %v845_v57 = vrot.slane %v838_v7, 4  ;;  %v840_v58 = vpop.permute.xlu0 %839  ;;  %v921_v13 = vor.u32 %v920_v18, %v917_v0  ;;  %v2025_v55 = vld [vmem:[%s2875_s4 + $0xb8] sm:$0xff]   ;;  %v2030_v0 = vld [vmem:[%s2875_s4 + $0x90] sm:$0xff]   ;;  %vm2958_vm0 = vmmov %vm2947_vm5 }
 0x420   :  { %882 = vst [vmem:[#allocation2 + $0x18] sm:$0xff] %v881_v9  ;;  %v846_v62 = vrot.slane %v840_v58, 4  ;;  %v939_v20 = vshrl.u32 %v881_v9, 16  ;;  %v942_v4 = vshll.u32 %v881_v9, 16 }
 0x421   :  { %v852_v63 = vsel %vm2945_vm9, %v845_v57, %v838_v7  ;;  %v922_v23 = vrot.slane %v921_v13, 4  ;;  %v2026_v57 = vld [vmem:[%s2875_s4 + $0xb0] sm:$0xff]   ;;  %vm2959_vm9 = vcmask 195584  }
 0x422   :  { %883 = vst.msk [vmem:[#allocation2 + $0x20] sm:$0xff] %vm2540_vm10, %v852_v63  ;;  %v853_v2 = vsel %vm2946_vm4, %v846_v62, %v840_v58  ;;  %v2583_v3 = vld [vmem:[#allocation2 + $0x8] sm:$0xff]  ;;  %v941_v15 = vrot.slane %v939_v20, 4  ;;  %v944_v16 = vrot.slane %v942_v4, 5  ;;  %vm2950_vm10 = vmmov %vm2947_vm5  ;;  %v1231_v40 = vld [vmem:[#allocation2] sm:$0xee] }
 0x423   :  { %v885_v5 = vsel %vm876_vm12, %v853_v2, %v884_v60  ;;  %v1855_v10 = vcombine.high %v866_v42, %v2583_v3  ;;  %v1854_v11 = vcombine.low %v866_v42, %v2583_v3  ;;  %v924_v19 = vshll.u32 %v2583_v3, 16  ;;  %v2024_v42 = vld [vmem:[%s2875_s4 + $0xc0] sm:$0xff]   ;;  %vm2955_vm12 = vmmov %vm2947_vm5  ;;  %v2027_v58 = vld [vmem:[%s2875_s4 + $0xa8] sm:$0xff]  }
 0x424   :  { %886 = vst [vmem:[#allocation2 + $0x28] sm:$0x11] %v885_v5  ;;  %v928_v12 = vshrl.u32 %v2583_v3, 16  ;;  %v945_v27 = vor.u32 %v944_v16, %v941_v15  ;;  %v1242_v38 = vrot.slane %v2583_v3, 5  ;;  %v1869_v46 = vrot.slane %v1231_v40, 9  ;;  %v2028_v60 = vld [vmem:[%s2875_s4 + $0xa0] sm:$0xff]  }
 0x425   :  { %1867 = vmatprep.mubr.msk.bf16.mxu0 %vm2947_vm5, %v1855_v10  ;;  %v926_v51 = vrot.slane %v924_v19, 5  ;;  %v2029_v62 = vld [vmem:[%s2875_s4 + $0x98] sm:$0xff]   ;;  %v2031_v20 = vld [vmem:[%s2875_s4 + $0xd0] sm:$0xff]   ;;  %vm2960_vm4 = vcmask 261120   ;;  %vm2961_vm5 = vcmask 326656  }
 0x426   :  { %1215 = vmatmul.mubr.bf16.vlgmr.msra.gmra.mxu0 %v1854_v11  ;;  %v909_v52 = vld [vmem:[#allocation2 + $0x10] sm:$0x11]  ;;  %v930_v14 = vrot.slane %v928_v12, 4  ;;  %v946_v43 = vrot.slane %v945_v27, 4  ;;  %v1244_v47 = vrot.slane %v1242_v38, 4  ;;  %v1243_v8 = vsel %vm2626_vm8, %v1869_v46, %v1242_v38 }
 0x427   :  { %v934_v54 = vshll.u32 %v909_v52, 16  ;;  %v927_v29 = vsel %vm2597_vm6, %v922_v23, %v926_v51  ;;  %v1245_v41 = vrot.slane %v909_v52, 5  ;;  %v1232_v4 = vld [vmem:[#allocation2 + $0x18] sm:$0xee] }
 0x428   :  { %v931_v56 = vor.u32 %v930_v14, %v926_v51  ;;  %v1870_v18 = vrot.slane %v1232_v4, 9 }
 0x429   :  { %v2595_v17 = vld [vmem:[#allocation2 + $0x20] sm:$0xff]  ;;  %v936_v59 = vrot.slane %v934_v54, 5  ;;  %v1246_v53 = vsel %vm2626_vm8, %v1244_v47, %v1245_v41 }
 0x42a   :  { %v1857_v22 = vcombine.high %v881_v9, %v2595_v17  ;;  %v932_v24 = vrot.slane %v931_v56, 4  ;;  %v948_v25 = vshll.u32 %v2595_v17, 16  ;;  %v952_v28 = vshrl.u32 %v2595_v17, 16 }
 0x42b   :  { %v2603_v26 = vld [vmem:[#allocation2 + $0x28] sm:$0x11]  ;;  %v1856_v31 = vcombine.low %v881_v9, %v2595_v17  ;;  %v1890_v9 = vcombine.high %v1243_v8, %v1246_v53  ;;  %v1249_v63 = vrot.slane %v2595_v17, 5  ;;  %v1889_v10 = vcombine.low %v1243_v8, %v1246_v53 }
 0x42c   :  { %1868 = vmatprep.mubr.msk.bf16.mxu0 %vm2950_vm10, %v1857_v22  ;;  %v937_v30 = vsel %vm2597_vm6, %v932_v24, %v936_v59  ;;  %v950_v32 = vrot.slane %v948_v25, 5  ;;  %v954_v36 = vrot.slane %v952_v28, 4  ;;  %v958_v37 = vshll.u32 %v2603_v26, 16 }
 0x42d   :  { %v1840_v33 = vcombine.high %v927_v29, %v937_v30  ;;  %v1839_v34 = vcombine.low %v927_v29, %v937_v30  ;;  %v1251_v2 = vrot.slane %v1249_v63, 4  ;;  %v1252_v3 = vrot.slane %v2603_v26, 5 }
 0x42e   :  { %1223 = vmatmul.mubr.bf16.gmra.mxu0 %v1856_v31  ;;  %v955_v39 = vor.u32 %v954_v36, %v950_v32  ;;  %v960_v45 = vrot.slane %v958_v37, 5  ;;  %v951_v48 = vsel %vm2597_vm6, %v946_v43, %v950_v32  ;;  %v1250_v11 = vsel %vm2626_vm8, %v1870_v18, %v1249_v63 }
 0x42f   :  { %1852 = vmatprep.mubr.msk.bf16.mxu1 %vm2951_vm15, %v1840_v33  ;;  %v1253_v5 = vsel %vm2626_vm8, %v1251_v2, %v1252_v3  ;;  %vm2965_vm10 = vcmask 588800   ;;  %vm2966_vm15 = vcmask 654336   ;;  %vm2969_vm8 = vcmask 850944  }
 0x430   :  { %1088 = vmatmul.mubr.bf16.vlgmr.msra.gmra.mxu1 %v1839_v34  ;;  %v956_v44 = vrot.slane %v955_v39, 4  ;;  %v1892_v19 = vcombine.high %v1250_v11, %v1253_v5  ;;  %v1891_v12 = vcombine.low %v1250_v11, %v1253_v5 }
 0x431   :  { %1348 = vmatpush1.bf16.msra.mxu1 %v2023_v35 }
 0x432   :  { %1349 = vmatprep.subr.bf16.mxu1 %v2051_v61  ;;  %v961_v49 = vsel %vm2597_vm6, %v956_v44, %v960_v45  ;;  %vm2964_vm6 = vcmask 523264  }
 0x433   :  { %v1842_v6 = vcombine.high %v951_v48, %v961_v49  ;;  %v1841_v7 = vcombine.low %v951_v48, %v961_v49 }
 0x435   :  { %1350 = vmatpush1.bf16.msra.mxu1 %v2024_v42  ;;  %1853 = vmatprep.mubr.msk.bf16.mxu1 %vm2954_vm13, %v1842_v6  ;;  %vm2970_vm13 = vcmask 916480  }
 0x436   :  { %1351 = vmatprep.subr.bf16.mxu1 %v2051_v61 }
 0x438   :  { %1096 = vmatmul.mubr.bf16.gmra.mxu1 %v1841_v7 }
 0x439   :  { %1352 = vmatpush1.bf16.msra.mxu1 %v2025_v55  ;;  %1902 = vmatprep.mubr.msk.bf16.mxu1 %vm2955_vm12, %v1890_v9  ;;  %vm2971_vm12 = vcmask 982016  }
 0x43a   :  { %1353 = vmatprep.subr.bf16.mxu1 %v2051_v61 }
 0x43d   :  { %1354 = vmatpush1.bf16.msra.mxu1 %v2026_v57 }
 0x43e   :  { %1355 = vmatprep.subr.bf16.mxu1 %v2051_v61 }
 0x441   :  { %1356 = vmatpush1.bf16.msra.mxu1 %v2027_v58 }
 0x442   :  { %1357 = vmatprep.subr.bf16.mxu1 %v2051_v61 }
 0x445   :  { %1358 = vmatpush1.bf16.msra.mxu1 %v2028_v60 }
 0x446   :  { %1359 = vmatprep.subr.bf16.mxu1 %v2051_v61 }
 0x449   :  { %1360 = vmatpush1.bf16.msra.mxu1 %v2029_v62 }
 0x44a   :  { %1361 = vmatprep.subr.bf16.mxu1 %v2051_v61 }
 0x44d   :  { %1362 = vmatpush1.bf16.msra.mxu1 %v2030_v0 }
 0x44e   :  { %1377 = vmatprep.subr.bf16.mxu1 %v2051_v61 }
 0x451   :  { %1378 = vmatpush2.bf16.msra.mxu1 %v2031_v20 }
 0x454   :  { %1380 = vmatmul.mubr.bf16.vlgmr.msra.gmra.mxu1 %v1889_v10 }
 0x455   :  { %1903 = vmatprep.mubr.msk.bf16.mxu1 %vm2956_vm14, %v1892_v19  ;;  %vm2972_vm14 = vmmov %vm2957_vm11 }
 0x45c   :  { %1388 = vmatmul.mubr.bf16.gmra.mxu1 %v1891_v12 }
 0x4e6   :  { %v1216_v51 = vpop.f32.mrf.mxu0 }
 0x4e8   :  { %v1218_v52 = vpop.f32.mrf.mxu0 }
 0x4ea   :  { %v1219_v13 = vpop.f32.mrf.mxu0 }
 0x4ec   :  { %v1221_v14 = vpop.f32.mrf.mxu0 }
 0x4ee   :  { %v1224_v61 = vpop.f32.mrf.mxu0 }
 0x4f0   :  { %v1089_v54 = vpop.f32.mrf.mxu1  ;;  %v1226_v15 = vpop.f32.mrf.mxu0 }
 0x4f1   :  { %v1217_v31 = vadd.f32 %v1216_v51, %v1089_v54 }
 0x4f2   :  { %v1091_v16 = vpop.f32.mrf.mxu1  ;;  %v1227_v56 = vpop.f32.mrf.mxu0 }
 0x4f4   :  { %v1092_v17 = vpop.f32.mrf.mxu1  ;;  %v1229_v21 = vpop.f32.mrf.mxu0 }
 0x4f5   :  { %v1220_v29 = vadd.f32 %v1219_v13, %v1092_v17 }
 0x4f6   :  { %v1094_v59 = vpop.f32.mrf.mxu1 }
 0x4f8   :  { %v1097_v22 = vpop.f32.mrf.mxu1 }
 0x4f9   :  { %v1225_v32 = vadd.f32 %v1224_v61, %v1097_v22 }
 0x4fa   :  { %v1099_v23 = vpop.f32.mrf.mxu1 }
 0x4fc   :  { %v1100_v24 = vpop.f32.mrf.mxu1 }
 0x4fd   :  { %v1228_v38 = vadd.f32 %v1227_v56, %v1100_v24 }
 0x4fe   :  { %v1102_v25 = vpop.f32.mrf.mxu1 }
 0x514   :  { %v1381_v26 = vpop.f32.mrf.mxu1 }
 0x515   :  { %v2673_v35 = vadd.f32 %v1381_v26, %v1217_v31 }
 0x516   :  { %v1383_v27 = vpop.f32.mrf.mxu1 }
 0x518   :  { %v1384_v28 = vpop.f32.mrf.mxu1 }
 0x519   :  { %v2671_v33 = vadd.f32 %v1384_v28, %v1220_v29 }
 0x51a   :  { %v1386_v30 = vpop.f32.mrf.mxu1 }
 0x51b   :  { %v1402_v39 = vadd.f32 %v2671_v33, %v2673_v35 }
 0x51c   :  { %v1389_v34 = vpop.f32.mrf.mxu1 }
 0x51d   :  { %v2675_v36 = vadd.f32 %v1389_v34, %v1225_v32 }
 0x51e   :  { %v1391_v37 = vpop.f32.mrf.mxu1 }
 0x51f   :  { %v1403_v41 = vadd.f32 %v1402_v39, %v2675_v36 }
 0x520   :  { %v1392_v40 = vpop.f32.mrf.mxu1 }
 0x521   :  { %v2680_v42 = vadd.f32 %v1392_v40, %v1228_v38 }
 0x522   :  { %v1394_v43 = vpop.f32.mrf.mxu1 }
 0x523   :  { %v1404_v44 = vadd.f32 %v1403_v41, %v2680_v42 }
 0x525   :  { %v1405_v45 = vrot.slane %v1404_v44, 4 }
 0x527   :  { %v1406_v46 = vadd.f32 %v1405_v45, %v1404_v44 }
 0x529   :  { %v1407_v47 = vrot.slane %v1406_v46, 2 }
 0x52b   :  { %v1408_v48 = vadd.f32 %v1407_v47, %v1406_v46 }
 0x52d   :  { %v1409_v49 = vrot.slane %v1408_v48, 1 }
 0x52f   :  { %v1410_v50 = vadd.f32 %v1409_v49, %v1408_v48 }
 0x531   :  { %1416 = vrot.lane.b32.xlu0 %v1410_v50, %s2039_s10  ;;  %1412 = vrot.lane.b32.xlu1 %v1410_v50, %s2037_s1 }
 0x535   :  { %1424 = vrot.lane.b32.xlu0 %v1410_v50, %s2038_s9  ;;  %1420 = vrot.lane.b32.xlu1 %v1410_v50, %s2036_s0 }
 0x539   :  { %1432 = vrot.lane.b32.xlu0 %v1410_v50, %s2040_s11  ;;  %1428 = vrot.lane.b32.xlu1 %v1410_v50, %s2041_s12 }
 0x53d   :  { %1440 = vrot.lane.b32.xlu0 %v1410_v50, %s2042_s13  ;;  %1436 = vrot.lane.b32.xlu1 %v1410_v50, %s2043_s14 }
 0x541   :  { %1448 = vrot.lane.b32.xlu0 %v1410_v50, %s2044_s15  ;;  %1444 = vrot.lane.b32.xlu1 %v1410_v50, %s2045_s16 }
 0x545   :  { %1456 = vrot.lane.b32.xlu0 %v1410_v50, %s2046_s17  ;;  %1452 = vrot.lane.b32.xlu1 %v1410_v50, %s2047_s18 }
 0x549   :  { %1464 = vrot.lane.b32.xlu0 %v1410_v50, %s2048_s19  ;;  %1460 = vrot.lane.b32.xlu1 %v1410_v50, %s2049_s20 }
 0x54d   :  { %1468 = vrot.lane.b32.xlu1 %v1410_v50, %s2050_s21 }
 0x5a3   :  { %v1417_v6 = vpop.permute.xlu0 %1416  ;;  %v1413_v53 = vpop.permute.xlu1 %1412 }
 0x5a4   :  { %v1415_v55 = vadd.f32 %v1413_v53, %v1410_v50 }
 0x5a6   :  { %v1419_v7 = vadd.f32 %v1417_v6, %v1415_v55 }
 0x5a7   :  { %v1425_v8 = vpop.permute.xlu0 %1424  ;;  %v1421_v9 = vpop.permute.xlu1 %1420 }
 0x5a8   :  { %v1423_v57 = vadd.f32 %v1421_v9, %v1419_v7 }
 0x5aa   :  { %v1427_v58 = vadd.f32 %v1425_v8, %v1423_v57 }
 0x5ab   :  { %v1433_v60 = vpop.permute.xlu0 %1432  ;;  %v1429_v62 = vpop.permute.xlu1 %1428 }
 0x5ac   :  { %v1431_v63 = vadd.f32 %v1429_v62, %v1427_v58 }
 0x5ae   :  { %v1435_v0 = vadd.f32 %v1433_v60, %v1431_v63 }
 0x5af   :  { %v1441_v2 = vpop.permute.xlu0 %1440  ;;  %v1437_v3 = vpop.permute.xlu1 %1436 }
 0x5b0   :  { %v1439_v20 = vadd.f32 %v1437_v3, %v1435_v0 }
 0x5b2   :  { %v1443_v4 = vadd.f32 %v1441_v2, %v1439_v20 }
 0x5b3   :  { %v1449_v18 = vpop.permute.xlu0 %1448  ;;  %v1445_v5 = vpop.permute.xlu1 %1444 }
 0x5b4   :  { %v1447_v10 = vadd.f32 %v1445_v5, %v1443_v4 }
 0x5b6   :  { %v1451_v11 = vadd.f32 %v1449_v18, %v1447_v10  ;;  %v2766_v18 = vld [vmem:[%s2876_s6] sm:$0x1] }
 0x5b7   :  { %v1457_v19 = vpop.permute.xlu0 %1456  ;;  %v1453_v12 = vpop.permute.xlu1 %1452  ;;  %v2770_v5 = vrot.slane %v2766_v18, %v2240_v1 }
 0x5b8   :  { %v1455_v51 = vadd.f32 %v1453_v12, %v1451_v11 }
 0x5ba   :  { %v1459_v52 = vadd.f32 %v1457_v19, %v1455_v51 }
 0x5bb   :  { %v1461_v13 = vpop.permute.xlu1 %1460  ;;  %v1465_v61 = vpop.permute.xlu0 %1464 }
 0x5bc   :  { %v1463_v14 = vadd.f32 %v1461_v13, %v1459_v52 }
 0x5be   :  { %v1467_v54 = vadd.f32 %v1465_v61, %v1463_v14 }
 0x5bf   :  { %v1469_v15 = vpop.permute.xlu1 %1468 }
 0x5c0   :  { %v1471_v16 = vadd.f32 %v1469_v15, %v1467_v54 }
 0x5c2   :  { %v1472_v56 = vmul.f32 0.001953125, %v1471_v16 }
 0x5c4   :  { %1477 = vrot.lane.b32.xlu1 %v1472_v56, %s2048_s19  ;;  %1474 = vrot.lane.b32.xlu0 %v1472_v56, %s2050_s21 }
 0x5c8   :  { %1483 = vrot.lane.b32.xlu1 %v1472_v56, %s2046_s17  ;;  %1480 = vrot.lane.b32.xlu0 %v1472_v56, %s2049_s20 }
 0x5cc   :  { %1489 = vrot.lane.b32.xlu1 %v1472_v56, %s2044_s15  ;;  %1486 = vrot.lane.b32.xlu0 %v1472_v56, %s2047_s18 }
 0x5d0   :  { %1495 = vrot.lane.b32.xlu1 %v1472_v56, %s2042_s13  ;;  %1492 = vrot.lane.b32.xlu0 %v1472_v56, %s2045_s16 }
 0x5d4   :  { %1501 = vrot.lane.b32.xlu1 %v1472_v56, %s2040_s11  ;;  %1498 = vrot.lane.b32.xlu0 %v1472_v56, %s2043_s14 }
 0x5d8   :  { %1507 = vrot.lane.b32.xlu1 %v1472_v56, %s2038_s9  ;;  %1504 = vrot.lane.b32.xlu0 %v1472_v56, %s2041_s12 }
 0x5dc   :  { %1513 = vrot.lane.b32.xlu1 %v1472_v56, %s2039_s10  ;;  %1510 = vrot.lane.b32.xlu0 %v1472_v56, %s2036_s0 }
 0x5e0   :  { %1516 = vrot.lane.b32.xlu0 %v1472_v56, %s2037_s1 }
 0x636   :  { %v1478_v17 = vpop.permute.xlu1 %1477  ;;  %v1475_v21 = vpop.permute.xlu0 %1474 }
 0x637   :  { %v1519_v59 = vsel %vm2957_vm11, %v1472_v56, %v1475_v21  ;;  %vm2973_vm11 = vmmov %vm2958_vm0 }
 0x638   :  { %v1520_v23 = vsel %vm2958_vm0, %v1519_v59, %v1478_v17  ;;  %vm2974_vm0 = vmmov %vm2959_vm9 }
 0x63a   :  { %v1484_v22 = vpop.permute.xlu1 %1483  ;;  %v1481_v24 = vpop.permute.xlu0 %1480 }
 0x63b   :  { %v1521_v25 = vsel %vm2959_vm9, %v1520_v23, %v1481_v24  ;;  %vm2975_vm9 = vmmov %vm2960_vm4 }
 0x63c   :  { %v1522_v27 = vsel %vm2960_vm4, %v1521_v25, %v1484_v22  ;;  %vm2976_vm4 = vmmov %vm2961_vm5 }
 0x63e   :  { %v1490_v26 = vpop.permute.xlu1 %1489  ;;  %v1487_v28 = vpop.permute.xlu0 %1486 }
 0x63f   :  { %v1523_v29 = vsel %vm2961_vm5, %v1522_v27, %v1487_v28  ;;  %vm2977_vm5 = vmmov %vm2962_vm1 }
 0x640   :  { %v1524_v31 = vsel %vm2962_vm1, %v1523_v29, %v1490_v26  ;;  %vm2978_vm1 = vmmov %vm2972_vm14 }
 0x642   :  { %v1496_v30 = vpop.permute.xlu1 %1495  ;;  %v1493_v32 = vpop.permute.xlu0 %1492 }
 0x643   :  { %v1525_v34 = vsel %vm2963_vm7, %v1524_v31, %v1493_v32 }
 0x644   :  { %v1526_v38 = vsel %vm2964_vm6, %v1525_v34, %v1496_v30  ;;  %vm2979_vm6 = vmmov %vm2973_vm11 }
 0x646   :  { %v1502_v37 = vpop.permute.xlu1 %1501  ;;  %v1499_v39 = vpop.permute.xlu0 %1498 }
 0x647   :  { %v1527_v40 = vsel %vm2965_vm10, %v1526_v38, %v1499_v39  ;;  %vm2980_vm10 = vcmask 523264  }
 0x648   :  { %v1528_v43 = vsel %vm2966_vm15, %v1527_v40, %v1502_v37  ;;  %vm2981_vm15 = vmmov %vm2974_vm0 }
 0x64a   :  { %v1508_v41 = vpop.permute.xlu1 %1507  ;;  %v1505_v44 = vpop.permute.xlu0 %1504 }
 0x64b   :  { %v1529_v45 = vsel %vm2967_vm3, %v1528_v43, %v1505_v44  ;;  %vm2982_vm3 = vmmov %vm2975_vm9 }
 0x64c   :  { %v1530_v46 = vsel %vm2968_vm2, %v1529_v45, %v1508_v41  ;;  %v1400_v41 = vld [vmem:[%s2877_s5] sm:$0x1]  ;;  %vm2983_vm2 = vmmov %vm2976_vm4 }
 0x64e   :  { %v1511_v47 = vpop.permute.xlu0 %1510  ;;  %v1514_v48 = vpop.permute.xlu1 %1513 }
 0x64f   :  { %v1531_v49 = vsel %vm2969_vm8, %v1530_v46, %v1511_v47  ;;  %vm2984_vm8 = vcmask 588800  }
 0x650   :  { %v1532_v50 = vsel %vm2970_vm13, %v1531_v49, %v1514_v48  ;;  %vm2985_vm13 = vmmov %vm2977_vm5 }
 0x652   :  { %v1517_v6 = vpop.permute.xlu0 %1516 }
 0x653   :  { %v1533_v53 = vsel %vm2971_vm12, %v1532_v50, %v1517_v6  ;;  %vm2986_vm12 = vmmov %vm2963_vm7 }
 0x654   :  { %v1537_v55 = vrot.slane %v1533_v53, %v2240_v1 }
 0x656   :  { %v2730_v7 = vsub.f32 %v2673_v35, %v1537_v55  ;;  %v2733_v8 = vsub.f32 %v2671_v33, %v1537_v55  ;;  %v2736_v9 = vsub.f32 %v2675_v36, %v1537_v55  ;;  %v2739_v57 = vsub.f32 %v2680_v42, %v1537_v55 }
 0x658   :  { %v1542_v58 = vmul.f32 %v2730_v7, %v2730_v7  ;;  %v1543_v60 = vmul.f32 %v2733_v8, %v2733_v8  ;;  %v1544_v62 = vmul.f32 %v2736_v9, %v2736_v9  ;;  %v1545_v33 = vmul.f32 %v2739_v57, %v2739_v57 }
 0x65a   :  { %v1546_v35 = vadd.f32 %v1543_v60, %v1542_v58 }
 0x65c   :  { %v1547_v63 = vadd.f32 %v1546_v35, %v1544_v62 }
 0x65e   :  { %v1548_v0 = vadd.f32 %v1547_v63, %v1545_v33 }
 0x660   :  { %v1549_v36 = vrot.slane %v1548_v0, 4 }
 0x662   :  { %v1550_v2 = vadd.f32 %v1549_v36, %v1548_v0 }
 0x664   :  { %v1551_v3 = vrot.slane %v1550_v2, 2 }
 0x666   :  { %v1552_v42 = vadd.f32 %v1551_v3, %v1550_v2 }
 0x668   :  { %v1553_v20 = vrot.slane %v1552_v42, 1 }
 0x66a   :  { %v1554_v4 = vadd.f32 %v1553_v20, %v1552_v42 }
 0x66c   :  { %1560 = vrot.lane.b32.xlu0 %v1554_v4, %s2039_s10  ;;  %1556 = vrot.lane.b32.xlu1 %v1554_v4, %s2037_s1 }
 0x670   :  { %1568 = vrot.lane.b32.xlu0 %v1554_v4, %s2038_s9  ;;  %1564 = vrot.lane.b32.xlu1 %v1554_v4, %s2036_s0 }
 0x674   :  { %1576 = vrot.lane.b32.xlu0 %v1554_v4, %s2040_s11  ;;  %1572 = vrot.lane.b32.xlu1 %v1554_v4, %s2041_s12 }
 0x678   :  { %1584 = vrot.lane.b32.xlu0 %v1554_v4, %s2042_s13  ;;  %1580 = vrot.lane.b32.xlu1 %v1554_v4, %s2043_s14 }
 0x67c   :  { %1592 = vrot.lane.b32.xlu0 %v1554_v4, %s2044_s15  ;;  %1588 = vrot.lane.b32.xlu1 %v1554_v4, %s2045_s16 }
 0x680   :  { %1600 = vrot.lane.b32.xlu0 %v1554_v4, %s2046_s17  ;;  %1596 = vrot.lane.b32.xlu1 %v1554_v4, %s2047_s18 }
 0x684   :  { %1608 = vrot.lane.b32.xlu0 %v1554_v4, %s2048_s19  ;;  %1604 = vrot.lane.b32.xlu1 %v1554_v4, %s2049_s20 }
 0x688   :  { %1612 = vrot.lane.b32.xlu1 %v1554_v4, %s2050_s21 }
 0x68c   :  { %1698 = vrot.lane.b32.xlu1 %v2770_v5, %s2050_s21 }
 0x690   :  { %1701 = vrot.lane.b32.xlu1 %v2770_v5, %s2048_s19 }
 0x694   :  { %1704 = vrot.lane.b32.xlu1 %v2770_v5, %s2049_s20 }
 0x698   :  { %1707 = vrot.lane.b32.xlu1 %v2770_v5, %s2046_s17 }
 0x69c   :  { %1710 = vrot.lane.b32.xlu1 %v2770_v5, %s2047_s18 }
 0x6a0   :  { %1713 = vrot.lane.b32.xlu1 %v2770_v5, %s2044_s15 }
 0x6a4   :  { %1716 = vrot.lane.b32.xlu1 %v2770_v5, %s2045_s16 }
 0x6a8   :  { %1719 = vrot.lane.b32.xlu1 %v2770_v5, %s2042_s13 }
 0x6ac   :  { %1722 = vrot.lane.b32.xlu1 %v2770_v5, %s2043_s14 }
 0x6b0   :  { %1725 = vrot.lane.b32.xlu1 %v2770_v5, %s2040_s11 }
 0x6de   :  { %v1561_v10 = vpop.permute.xlu0 %1560  ;;  %v1557_v11 = vpop.permute.xlu1 %1556 }
 0x6df   :  { %v1559_v19 = vadd.f32 %v1557_v11, %v1554_v4 }
 0x6e1   :  { %v1563_v12 = vadd.f32 %v1561_v10, %v1559_v19 }
 0x6e2   :  { %v1569_v51 = vpop.permute.xlu0 %1568  ;;  %v1565_v52 = vpop.permute.xlu1 %1564 }
 0x6e3   :  { %v1567_v13 = vadd.f32 %v1565_v52, %v1563_v12 }
 0x6e5   :  { %v1571_v14 = vadd.f32 %v1569_v51, %v1567_v13 }
 0x6e6   :  { %v1577_v61 = vpop.permute.xlu0 %1576  ;;  %v1573_v54 = vpop.permute.xlu1 %1572 }
 0x6e7   :  { %v1575_v15 = vadd.f32 %v1573_v54, %v1571_v14 }
 0x6e9   :  { %v1579_v16 = vadd.f32 %v1577_v61, %v1575_v15 }
 0x6ea   :  { %v1585_v56 = vpop.permute.xlu0 %1584  ;;  %v1581_v17 = vpop.permute.xlu1 %1580 }
 0x6eb   :  { %v1583_v21 = vadd.f32 %v1581_v17, %v1579_v16 }
 0x6ed   :  { %v1587_v59 = vadd.f32 %v1585_v56, %v1583_v21 }
 0x6ee   :  { %v1593_v22 = vpop.permute.xlu0 %1592  ;;  %v1589_v23 = vpop.permute.xlu1 %1588 }
 0x6ef   :  { %v1591_v24 = vadd.f32 %v1589_v23, %v1587_v59 }
 0x6f1   :  { %v1595_v25 = vadd.f32 %v1593_v22, %v1591_v24 }
 0x6f2   :  { %v1601_v26 = vpop.permute.xlu0 %1600  ;;  %v1597_v27 = vpop.permute.xlu1 %1596 }
 0x6f3   :  { %v1599_v28 = vadd.f32 %v1597_v27, %v1595_v25 }
 0x6f5   :  { %v1603_v29 = vadd.f32 %v1601_v26, %v1599_v28 }
 0x6f6   :  { %v1605_v30 = vpop.permute.xlu1 %1604  ;;  %v1609_v32 = vpop.permute.xlu0 %1608 }
 0x6f7   :  { %v1607_v31 = vadd.f32 %v1605_v30, %v1603_v29 }
 0x6f9   :  { %v1611_v34 = vadd.f32 %v1609_v32, %v1607_v31 }
 0x6fa   :  { %v1613_v37 = vpop.permute.xlu1 %1612 }
 0x6fb   :  { %v1615_v38 = vadd.f32 %v1613_v37, %v1611_v34 }
 0x6fd   :  { %v1616_v39 = vmul.f32 0.001953125, %v1615_v38 }
 0x6fe   :  { %v1699_v46 = vpop.permute.xlu1 %1698 }
 0x6ff   :  { %v1617_v40 = vadd.f32 1e-05, %v1616_v39  ;;  %v1743_v63 = vsel %vm2972_vm14, %v2766_v18, %v1699_v46  ;;  %vm2987_vm14 = vmmov %vm2980_vm10 }
 0x701   :  { %2034 = vrsqrt.f32 %v1617_v40 }
 0x702   :  { %v1702_v47 = vpop.permute.xlu1 %1701 }
 0x703   :  { %v1744_v2 = vsel %vm2973_vm11, %v1743_v63, %v1702_v47  ;;  %vm2988_vm11 = vcmask 654336  }
 0x706   :  { %v1705_v48 = vpop.permute.xlu1 %1704 }
 0x707   :  { %v1745_v42 = vsel %vm2974_vm0, %v1744_v2, %v1705_v48  ;;  %vm2989_vm0 = vmmov %vm2984_vm8 }
 0x70a   :  { %v1708_v49 = vpop.permute.xlu1 %1707 }
 0x70e   :  { %v2035_v43 = vpop.eup %2034  ;;  %v1711_v50 = vpop.permute.xlu1 %1710 }
 0x70f   :  { %v1619_v44 = vmul.f32 %v2035_v43, %v1400_v41 }
 0x711   :  { %v1624_v45 = vrot.slane %v1619_v44, %v2240_v1 }
 0x712   :  { %v1714_v53 = vpop.permute.xlu1 %1713 }
 0x713   :  { %1628 = vrot.lane.b32.xlu1 %v1624_v45, %s2048_s19  ;;  %1625 = vrot.lane.b32.xlu0 %v1624_v45, %s2050_s21 }
 0x716   :  { %v1717_v60 = vpop.permute.xlu1 %1716 }
 0x717   :  { %1631 = vrot.lane.b32.xlu0 %v1624_v45, %s2049_s20  ;;  %1728 = vrot.lane.b32.xlu1 %v2770_v5, %s2041_s12 }
 0x71a   :  { %v1720_v35 = vpop.permute.xlu1 %1719 }
 0x71b   :  { %1634 = vrot.lane.b32.xlu0 %v1624_v45, %s2046_s17  ;;  %1731 = vrot.lane.b32.xlu1 %v2770_v5, %s2038_s9 }
 0x71e   :  { %v1723_v36 = vpop.permute.xlu1 %1722 }
 0x71f   :  { %1637 = vrot.lane.b32.xlu0 %v1624_v45, %s2047_s18  ;;  %1734 = vrot.lane.b32.xlu1 %v2770_v5, %s2036_s0 }
 0x722   :  { %v1726_v20 = vpop.permute.xlu1 %1725 }
 0x723   :  { %1640 = vrot.lane.b32.xlu0 %v1624_v45, %s2044_s15  ;;  %1740 = vrot.lane.b32.xlu1 %v2770_v5, %s2037_s1 }
 0x727   :  { %1643 = vrot.lane.b32.xlu0 %v1624_v45, %s2045_s16 }
 0x72b   :  { %1646 = vrot.lane.b32.xlu0 %v1624_v45, %s2042_s13 }
 0x72f   :  { %1649 = vrot.lane.b32.xlu0 %v1624_v45, %s2043_s14 }
 0x733   :  { %1652 = vrot.lane.b32.xlu0 %v1624_v45, %s2040_s11 }
 0x737   :  { %1655 = vrot.lane.b32.xlu0 %v1624_v45, %s2041_s12 }
 0x73b   :  { %1658 = vrot.lane.b32.xlu0 %v1624_v45, %s2038_s9 }
 0x73f   :  { %1661 = vrot.lane.b32.xlu0 %v1624_v45, %s2036_s0 }
 0x743   :  { %1664 = vrot.lane.b32.xlu0 %v1624_v45, %s2039_s10 }
 0x747   :  { %1667 = vrot.lane.b32.xlu0 %v1624_v45, %s2037_s1 }
 0x74b   :  { %1737 = vrot.lane.b32.xlu0 %v2770_v5, %s2039_s10  ;;  %v1746_v5 = vsel %vm2975_vm9, %v1745_v42, %v1708_v49  ;;  %vm2990_vm9 = vmmov %vm2988_vm11 }
 0x74c   :  { %v1747_v10 = vsel %vm2976_vm4, %v1746_v5, %v1711_v50  ;;  %vm2991_vm4 = vcmask 719872  }
 0x74d   :  { %v1748_v12 = vsel %vm2977_vm5, %v1747_v10, %v1714_v53  ;;  %vm2992_vm5 = vmmov %vm2991_vm4 }
 0x74e   :  { %v1749_v52 = vsel %vm2963_vm7, %v1748_v12, %v1717_v60  ;;  %vm2994_vm7 = vcmask 850944  }
 0x74f   :  { %v1750_v54 = vsel %vm2980_vm10, %v1749_v52, %v1720_v35 }
 0x750   :  { %v1751_v17 = vsel %vm2984_vm8, %v1750_v54, %v1723_v36 }
 0x751   :  { %v1752_v25 = vsel %vm2988_vm11, %v1751_v17, %v1726_v20 }
 0x785   :  { %v1626_v6 = vpop.permute.xlu0 %1625  ;;  %v1629_v19 = vpop.permute.xlu1 %1628 }
 0x786   :  { %v1670_v18 = vsel %vm2978_vm1, %v1619_v44, %v1626_v6  ;;  %vm2993_vm1 = vcmask 785408  }
 0x787   :  { %v1671_v14 = vsel %vm2979_vm6, %v1670_v18, %v1629_v19  ;;  %vm2995_vm6 = vcmask 916480   ;;  %vm2996_vm10 = vmmov %vm2993_vm1 }
 0x789   :  { %v1632_v55 = vpop.permute.xlu0 %1631  ;;  %v1729_v13 = vpop.permute.xlu1 %1728 }
 0x78a   :  { %v1672_v15 = vsel %vm2981_vm15, %v1671_v14, %v1632_v55  ;;  %v1753_v30 = vsel %vm2992_vm5, %v1752_v25, %v1729_v13  ;;  %vm2997_vm15 = vcmask 982016  }
 0x78b   :  { %vm3000_vm8 = vmmov %vm2997_vm15 }
 0x78d   :  { %v1635_v58 = vpop.permute.xlu0 %1634  ;;  %v1732_v22 = vpop.permute.xlu1 %1731 }
 0x78e   :  { %v1673_v16 = vsel %vm2982_vm3, %v1672_v15, %v1635_v58  ;;  %v1754_v39 = vsel %vm2996_vm10, %v1753_v30, %v1732_v22  ;;  %vm2998_vm3 = vmmov %vm2994_vm7 }
 0x791   :  { %v1638_v62 = vpop.permute.xlu0 %1637  ;;  %v1735_v32 = vpop.permute.xlu1 %1734 }
 0x792   :  { %v1674_v56 = vsel %vm2983_vm2, %v1673_v16, %v1638_v62  ;;  %v1755_v44 = vsel %vm2998_vm3, %v1754_v39, %v1735_v32  ;;  %vm2999_vm2 = vmmov %vm2995_vm6 }
 0x795   :  { %v1641_v33 = vpop.permute.xlu0 %1640  ;;  %v1741_v43 = vpop.permute.xlu1 %1740 }
 0x796   :  { %v1675_v21 = vsel %vm2985_vm13, %v1674_v56, %v1641_v33 }
 0x799   :  { %v1644_v0 = vpop.permute.xlu0 %1643 }
 0x79a   :  { %v1676_v23 = vsel %vm2986_vm12, %v1675_v21, %v1644_v0 }
 0x79d   :  { %v1647_v3 = vpop.permute.xlu0 %1646 }
 0x79e   :  { %v1677_v24 = vsel %vm2987_vm14, %v1676_v23, %v1647_v3 }
 0x7a1   :  { %v1650_v4 = vpop.permute.xlu0 %1649 }
 0x7a2   :  { %v1678_v26 = vsel %vm2989_vm0, %v1677_v24, %v1650_v4 }
 0x7a5   :  { %v1653_v11 = vpop.permute.xlu0 %1652 }
 0x7a6   :  { %v1679_v27 = vsel %vm2990_vm9, %v1678_v26, %v1653_v11 }
 0x7a9   :  { %v1656_v51 = vpop.permute.xlu0 %1655 }
 0x7aa   :  { %v1680_v29 = vsel %vm2991_vm4, %v1679_v27, %v1656_v51 }
 0x7ad   :  { %v1659_v61 = vpop.permute.xlu0 %1658 }
 0x7ae   :  { %v1681_v31 = vsel %vm2993_vm1, %v1680_v29, %v1659_v61 }
 0x7b1   :  { %v1662_v59 = vpop.permute.xlu0 %1661 }
 0x7b2   :  { %v1682_v34 = vsel %vm2994_vm7, %v1681_v31, %v1662_v59 }
 0x7b5   :  { %v1665_v28 = vpop.permute.xlu0 %1664 }
 0x7b6   :  { %v1683_v37 = vsel %vm2995_vm6, %v1682_v34, %v1665_v28 }
 0x7b9   :  { %v1668_v38 = vpop.permute.xlu0 %1667 }
 0x7ba   :  { %v1684_v40 = vsel %vm2997_vm15, %v1683_v37, %v1668_v38 }
 0x7bb   :  { %v1688_v41 = vrot.slane %v1684_v40, %v2240_v1 }
 0x7bd   :  { %v1738_v45 = vpop.permute.xlu0 %1737  ;;  %v1689_v47 = vmul.f32 %v1688_v41, %v2730_v7  ;;  %v1690_v49 = vmul.f32 %v1688_v41, %v2733_v8  ;;  %v1691_v50 = vmul.f32 %v1688_v41, %v2736_v9  ;;  %v1692_v6 = vmul.f32 %v1688_v41, %v2739_v57 }
 0x7be   :  { %v1756_v46 = vsel %vm2999_vm2, %v1755_v44, %v1738_v45 }
 0x7bf   :  { %v1757_v48 = vsel %vm3000_vm8, %v1756_v46, %v1741_v43 }
 0x7c0   :  { %v1761_v53 = vrot.slane %v1757_v48, %v2240_v1 }
 0x7c2   :  { %v1762_v55 = vadd.f32 %v1761_v53, %v1689_v47  ;;  %v1763_v58 = vadd.f32 %v1761_v53, %v1690_v49  ;;  %v1764_v60 = vadd.f32 %v1761_v53, %v1691_v50  ;;  %v1765_v62 = vadd.f32 %v1761_v53, %v1692_v6 }
 0x7c4   :  { %v1766_v35 = vmax.f32 %v1762_v55, 0.0  ;;  %v1767_v33 = vmax.f32 %v1763_v58, 0.0  ;;  %v1768_v63 = vmax.f32 %v1764_v60, 0.0  ;;  %v1769_v0 = vmax.f32 %v1765_v62, 0.0 }
 0x7c6   :  { %1770 = vst [vmem:[%s2878_s7] sm:$0xff] %v1766_v35  ;;  %1771 = vst [vmem:[%s2878_s7 + $0x8] sm:$0xff] %v1767_v33 }
 0x7c7   :  { %1772 = vst [vmem:[%s2878_s7 + $0x10] sm:$0xff] %v1768_v63  ;;  %1773 = vst [vmem:[%s2878_s7 + $0x18] sm:$0xff] %v1769_v0 }

</bundles_post_ra>
